<compile_context>
chip_gen: v7x
topology: tpu7x:2x2x1
jax: 0.10.0
libtpu: 0.0.40
codegen_flags: <defaults>
</compile_context>

<pallas_src>
import numpy as np
import jax
import jax.numpy as jnp
from jax.experimental import pallas as pl
from jax.experimental.pallas import tpu as pltpu

# Model hyper-parameters (small, consistent with the PyTorch module's
# structure: embed/hidden/latent sizes, 1 LSTM layer, num_genres=3).
VOCAB = 48
EMBED = 32
HIDDEN = 32
LATENT = 16
GENRES = 3
VPAD = 128            # vocab padded to a full 128-lane vreg for dense stores


# ---------------------------------------------------------------------------
# Fused VAE kernel
# ---------------------------------------------------------------------------
def music_vae_kernel(emb_ref, gemb_ref, eps_ref,
                     ewx_ref, ewg_ref, eb_ref, ewh_ref,
                     wmu_ref, bmu_ref, wlv_ref, blv_ref,
                     wlz_ref, wlg_ref, blh_ref,
                     dwi_ref, db_ref, dwh_ref,
                     wout_ref, bout_ref,
                     logits_ref, mu_ref, lv_ref,
                     h_all_ref):
    TB = emb_ref.shape[0]
    Bp = gemb_ref.shape[0]
    T = TB // Bp
    H = ewh_ref.shape[0]

    emb = emb_ref[...]            # (T*Bp, E), time-major flattened
    gemb = gemb_ref[...]          # (Bp, E)

    def unrolled_lstm(x_gates, whh, h, c, record=None):
        # x_gates: (T*Bp, 4H) pre-computed input projection (+bias [+genre]).
        # Fully unrolled over the static T so adjacent steps can interleave.
        for t in range(T):
            gates = (x_gates[t * Bp:(t + 1) * Bp, :]
                     + jnp.dot(h, whh, preferred_element_type=jnp.float32))
            i = jax.nn.sigmoid(gates[:, 0 * H:1 * H])
            f = jax.nn.sigmoid(gates[:, 1 * H:2 * H])
            g = jnp.tanh(gates[:, 2 * H:3 * H])
            o = jax.nn.sigmoid(gates[:, 3 * H:4 * H])
            c = f * c + i * g
            h = o * jnp.tanh(c)
            if record is not None:
                record[t * Bp:(t + 1) * Bp, :] = h
        return h, c

    # ---- Encoder ------------------------------------------------------------
    # concat([embedded, genre_emb]) @ W_ih is realized with split weights:
    # the time-constant genre contribution (+ combined bias) is folded into the
    # hoisted input projection once, outside the recurrence.
    g_pre = (jnp.dot(gemb, ewg_ref[...], preferred_element_type=jnp.float32)
             + eb_ref[...])                                       # (Bp, 4H)
    xg_enc = (jnp.dot(emb, ewx_ref[...], preferred_element_type=jnp.float32)
              + jnp.concatenate([g_pre] * T, axis=0))             # (T*Bp, 4H)

    zeros_h = jnp.zeros((Bp, H), jnp.float32)
    h_last, _ = unrolled_lstm(xg_enc, ewh_ref[...], zeros_h, zeros_h)

    mu = (jnp.dot(h_last, wmu_ref[...], preferred_element_type=jnp.float32)
          + bmu_ref[...])
    lv = (jnp.dot(h_last, wlv_ref[...], preferred_element_type=jnp.float32)
          + blv_ref[...])
    mu_ref[...] = mu
    lv_ref[...] = lv

    # ---- Reparameterize + decoder initial state -----------------------------
    z = mu + eps_ref[...] * jnp.exp(0.5 * lv)
    h_dec = (jnp.dot(z, wlz_ref[...], preferred_element_type=jnp.float32)
             + jnp.dot(gemb, wlg_ref[...], preferred_element_type=jnp.float32)
             + blh_ref[...])                                      # (Bp, H)
    c_dec = jnp.zeros_like(h_dec)

    # ---- Decoder (teacher forcing on the same token embeddings) -------------
    xg_dec = (jnp.dot(emb, dwi_ref[...], preferred_element_type=jnp.float32)
              + db_ref[...])                                      # (T*Bp, 4H)
    unrolled_lstm(xg_dec, dwh_ref[...], h_dec, c_dec, record=h_all_ref)

    # Batched output projection: one (T*Bp, H) x (H, VPAD) matmul, one
    # lane-dense (64, 128) store.
    logits_ref[...] = (jnp.dot(h_all_ref[...], wout_ref[...],
                               preferred_element_type=jnp.float32)
                       + bout_ref[...])


# ---------------------------------------------------------------------------
# Wrapper: embedding gathers + batch padding + pallas_call (JAX glue only)
# ---------------------------------------------------------------------------
def music_vae_forward(params, x, genre, eps):
    """x: (B, T) int32 token ids, genre: (B,) int32, eps: (B, LATENT) f32."""
    B, T = x.shape
    Bp = ((B + 7) // 8) * 8            # pad batch to a full 8-sublane group
    pad = Bp - B
    if pad:
        x = jnp.pad(x, ((0, pad), (0, 0)))
        genre = jnp.pad(genre, ((0, pad),))
        eps = jnp.pad(eps, ((0, pad), (0, 0)))

    emb_t = jnp.take(params["embedding"], x.T, axis=0)            # (T, Bp, E)
    gemb = jnp.take(params["genre_embedding"], genre, axis=0)     # (Bp, E)
    emb_flat = emb_t.reshape(T * Bp, EMBED)                       # time-major

    # Pad vocab dim of the output projection to 128 lanes (zeros).
    wout_p = jnp.pad(params["w_out"], ((0, 0), (0, VPAD - VOCAB)))
    bout_p = jnp.pad(params["b_out"], ((0, 0), (0, VPAD - VOCAB)))

    args = (emb_flat, gemb, eps,
            params["enc_wih_x"], params["enc_wih_g"],
            params["enc_b"], params["enc_whh"],
            params["w_mu"], params["b_mu"], params["w_lv"], params["b_lv"],
            params["w_lh_z"], params["w_lh_g"], params["b_lh"],
            params["dec_wih"], params["dec_b"], params["dec_whh"],
            wout_p, bout_p)

    vmem = pltpu.MemorySpace.VMEM
    logits_flat, mu, logvar = pl.pallas_call(
        music_vae_kernel,
        out_shape=(jax.ShapeDtypeStruct((T * Bp, VPAD), jnp.float32),
                   jax.ShapeDtypeStruct((Bp, LATENT), jnp.float32),
                   jax.ShapeDtypeStruct((Bp, LATENT), jnp.float32)),
        in_specs=[pl.BlockSpec(memory_space=vmem)] * len(args),
        out_specs=(pl.BlockSpec(memory_space=vmem),
                   pl.BlockSpec(memory_space=vmem),
                   pl.BlockSpec(memory_space=vmem)),
        scratch_shapes=[pltpu.VMEM((T * Bp, HIDDEN), jnp.float32)],
    )(*args)

    # (T*Bp, VPAD) -> (B, T, V): drop batch/vocab padding, back to batch-first.
    logits = jnp.transpose(
        logits_flat.reshape(T, Bp, VPAD)[:, :B, :VOCAB], (1, 0, 2))
    return logits, mu[:B], logvar[:B]


# ---------------------------------------------------------------------------
# Deterministic parameter init (synthetic weights; shapes mirror the nn.Module,
# stored transposed / split for the kernel).
# ---------------------------------------------------------------------------
def init_params(key):
    ks = jax.random.split(key, 18)

    def w(k, shape, scale=0.1):
        return scale * jax.random.normal(k, shape, jnp.float32)

    H4 = 4 * HIDDEN
    return dict(
        embedding=w(ks[0], (VOCAB, EMBED)),
        genre_embedding=w(ks[1], (GENRES, EMBED)),
        enc_wih_x=w(ks[2], (EMBED, H4)),       # encoder W_ih, embedded half
        enc_wih_g=w(ks[3], (EMBED, H4)),       # encoder W_ih, genre half
        enc_whh=w(ks[4], (HIDDEN, H4)),
        enc_b=w(ks[5], (1, H4), 0.01),         # b_ih + b_hh combined
        w_mu=w(ks[6], (HIDDEN, LATENT)),
        b_mu=w(ks[7], (1, LATENT), 0.01),
        w_lv=w(ks[8], (HIDDEN, LATENT)),
        b_lv=w(ks[9], (1, LATENT), 0.01),
        w_lh_z=w(ks[10], (LATENT, HIDDEN)),    # latent_to_hidden, z half
        w_lh_g=w(ks[11], (EMBED, HIDDEN)),     # latent_to_hidden, genre half
        b_lh=w(ks[12], (1, HIDDEN), 0.01),
        dec_wih=w(ks[13], (EMBED, H4)),
        dec_whh=w(ks[14], (HIDDEN, H4)),
        dec_b=w(ks[15], (1, H4), 0.01),
        w_out=w(ks[16], (HIDDEN, VOCAB)),
        b_out=w(ks[17], (1, VOCAB), 0.01),
    )


# ---------------------------------------------------------------------------
# Pure-JAX reference (mirrors the PyTorch forward) for the correctness check.
# ---------------------------------------------------------------------------
def reference_forward(params, x, genre, eps):
    emb = jnp.take(params["embedding"], x, axis=0)
    gemb = jnp.take(params["genre_embedding"], genre, axis=0)
    B, T, _ = emb.shape

    def lstm(x_seq, h, c, wih, whh, b):
        outs = []
        for t in range(x_seq.shape[1]):
            gates = x_seq[:, t] @ wih + h @ whh + b
            i = jax.nn.sigmoid(gates[:, 0 * HIDDEN:1 * HIDDEN])
            f = jax.nn.sigmoid(gates[:, 1 * HIDDEN:2 * HIDDEN])
            g = jnp.tanh(gates[:, 2 * HIDDEN:3 * HIDDEN])
            o = jax.nn.sigmoid(gates[:, 3 * HIDDEN:4 * HIDDEN])
            c = f * c + i * g
            h = o * jnp.tanh(c)
            outs.append(h)
        return jnp.stack(outs, axis=1), h, c

    enc_wih = jnp.concatenate([params["enc_wih_x"], params["enc_wih_g"]], axis=0)
    combined = jnp.concatenate(
        [emb, jnp.broadcast_to(gemb[:, None, :], (B, T, EMBED))], axis=2)
    _, h_last, _ = lstm(combined, jnp.zeros((B, HIDDEN)), jnp.zeros((B, HIDDEN)),
                        enc_wih, params["enc_whh"], params["enc_b"])
    mu = h_last @ params["w_mu"] + params["b_mu"]
    logvar = h_last @ params["w_lv"] + params["b_lv"]
    z = mu + eps * jnp.exp(0.5 * logvar)

    w_lh = jnp.concatenate([params["w_lh_z"], params["w_lh_g"]], axis=0)
    h0 = jnp.concatenate([z, gemb], axis=1) @ w_lh + params["b_lh"]
    out, _, _ = lstm(emb, h0, jnp.zeros_like(h0),
                     params["dec_wih"], params["dec_whh"], params["dec_b"])
    logits = out @ params["w_out"] + params["b_out"]
    return logits, mu, logvar


if __name__ == "__main__":
    key = jax.random.PRNGKey(0)
    k_param, k_x, k_g, k_eps = jax.random.split(key, 4)

    B, T = 4, 8
    params = init_params(k_param)
    x = jax.random.randint(k_x, (B, T), 0, VOCAB, dtype=jnp.int32)
    genre = jax.random.randint(k_g, (B,), 0, GENRES, dtype=jnp.int32)
    eps = jax.random.normal(k_eps, (B, LATENT), jnp.float32)  # reparam noise

    logits, mu, logvar = jax.block_until_ready(
        jax.jit(music_vae_forward)(params, x, genre, eps))

    # Tolerance tightened 4x vs the previous version; residual slack covers
    # MXU bf16-pass rounding differences between the Pallas and XLA lowerings
    # of f32 matmuls (default precision), amplified through the recurrence.
    ref_logits, ref_mu, ref_logvar = reference_forward(params, x, genre, eps)
    np.testing.assert_allclose(np.asarray(mu), np.asarray(ref_mu),
                               atol=5e-3, rtol=5e-3)
    np.testing.assert_allclose(np.asarray(logvar), np.asarray(ref_logvar),
                               atol=5e-3, rtol=5e-3)
    np.testing.assert_allclose(np.asarray(logits), np.asarray(ref_logits),
                               atol=5e-3, rtol=5e-3)

    assert logits.shape == (B, T, VOCAB)
    assert mu.shape == (B, LATENT) and logvar.shape == (B, LATENT)
    print("KERNEL_OK")
</pallas_src>

<mosaic_0001>
module attributes {stable_mosaic.version = 11 : i64} {
  func.func @music_vae_kernel(%arg0: memref<64x32xf32, #tpu.memory_space<vmem>>, %arg1: memref<8x32xf32, #tpu.memory_space<vmem>>, %arg2: memref<8x16xf32, #tpu.memory_space<vmem>>, %arg3: memref<32x128xf32, #tpu.memory_space<vmem>>, %arg4: memref<32x128xf32, #tpu.memory_space<vmem>>, %arg5: memref<1x128xf32, #tpu.memory_space<vmem>>, %arg6: memref<32x128xf32, #tpu.memory_space<vmem>>, %arg7: memref<32x16xf32, #tpu.memory_space<vmem>>, %arg8: memref<1x16xf32, #tpu.memory_space<vmem>>, %arg9: memref<32x16xf32, #tpu.memory_space<vmem>>, %arg10: memref<1x16xf32, #tpu.memory_space<vmem>>, %arg11: memref<16x32xf32, #tpu.memory_space<vmem>>, %arg12: memref<32x32xf32, #tpu.memory_space<vmem>>, %arg13: memref<1x32xf32, #tpu.memory_space<vmem>>, %arg14: memref<32x128xf32, #tpu.memory_space<vmem>>, %arg15: memref<1x128xf32, #tpu.memory_space<vmem>>, %arg16: memref<32x128xf32, #tpu.memory_space<vmem>>, %arg17: memref<32x128xf32, #tpu.memory_space<vmem>>, %arg18: memref<1x128xf32, #tpu.memory_space<vmem>>, %arg19: memref<64x128xf32, #tpu.memory_space<vmem>>, %arg20: memref<8x16xf32, #tpu.memory_space<vmem>>, %arg21: memref<8x16xf32, #tpu.memory_space<vmem>>, %arg22: memref<64x32xf32, #tpu.memory_space<vmem>>) attributes {dimension_semantics = [], scalar_prefetch = 0 : i64, scratch_operands = 1 : i64, tpu.core_type = #tpu.core_type<tc>} {
    %c0 = arith.constant 0 : index
    %c0_0 = arith.constant 0 : index
    %0 = vector.load %arg0[%c0, %c0_0] : memref<64x32xf32, #tpu.memory_space<vmem>>, vector<64x32xf32>
    %c0_1 = arith.constant 0 : index
    %c0_2 = arith.constant 0 : index
    %1 = vector.load %arg1[%c0_1, %c0_2] : memref<8x32xf32, #tpu.memory_space<vmem>>, vector<8x32xf32>
    %c0_3 = arith.constant 0 : index
    %c0_4 = arith.constant 0 : index
    %2 = vector.load %arg4[%c0_3, %c0_4] : memref<32x128xf32, #tpu.memory_space<vmem>>, vector<32x128xf32>
    %cst = arith.constant dense<0.000000e+00> : vector<8x128xf32>
    %3 = tpu.matmul %1, %2, %cst {dimension_numbers = #tpu.dot_dimension_numbers<[1], [0], [0], [1], [0, 0, 1, 1], [], []>} : vector<8x32xf32>, vector<32x128xf32>, vector<8x128xf32> -> vector<8x128xf32>
    %c0_5 = arith.constant 0 : index
    %c0_6 = arith.constant 0 : index
    %4 = vector.load %arg5[%c0_5, %c0_6] : memref<1x128xf32, #tpu.memory_space<vmem>>, vector<1x128xf32>
    %5 = vector.broadcast %4 : vector<1x128xf32> to vector<8x128xf32>
    %6 = arith.addf %3, %5 : vector<8x128xf32>
    %c0_7 = arith.constant 0 : index
    %c0_8 = arith.constant 0 : index
    %7 = vector.load %arg3[%c0_7, %c0_8] : memref<32x128xf32, #tpu.memory_space<vmem>>, vector<32x128xf32>
    %cst_9 = arith.constant dense<0.000000e+00> : vector<64x128xf32>
    %8 = tpu.matmul %0, %7, %cst_9 {dimension_numbers = #tpu.dot_dimension_numbers<[1], [0], [0], [1], [0, 0, 1, 1], [], []>} : vector<64x32xf32>, vector<32x128xf32>, vector<64x128xf32> -> vector<64x128xf32>
    %9 = tpu.concatenate %6, %6, %6, %6, %6, %6, %6, %6 in 0 : vector<8x128xf32>, vector<8x128xf32>, vector<8x128xf32>, vector<8x128xf32>, vector<8x128xf32>, vector<8x128xf32>, vector<8x128xf32>, vector<8x128xf32> -> vector<64x128xf32>
    %10 = arith.addf %8, %9 : vector<64x128xf32>
    %cst_10 = arith.constant 0.000000e+00 : f32
    %11 = vector.broadcast %cst_10 : f32 to vector<8x32xf32>
    %c0_11 = arith.constant 0 : index
    %c0_12 = arith.constant 0 : index
    %12 = vector.load %arg6[%c0_11, %c0_12] : memref<32x128xf32, #tpu.memory_space<vmem>>, vector<32x128xf32>
    %13 = vector.extract_strided_slice %10 {offsets = [0, 0], sizes = [8, 128], strides = [1, 1]} : vector<64x128xf32> to vector<8x128xf32>
    %cst_13 = arith.constant dense<0.000000e+00> : vector<8x128xf32>
    %14 = tpu.matmul %11, %12, %cst_13 {dimension_numbers = #tpu.dot_dimension_numbers<[1], [0], [0], [1], [0, 0, 1, 1], [], []>} : vector<8x32xf32>, vector<32x128xf32>, vector<8x128xf32> -> vector<8x128xf32>
    %15 = arith.addf %13, %14 : vector<8x128xf32>
    %16 = vector.extract_strided_slice %15 {offsets = [0, 0], sizes = [8, 32], strides = [1, 1]} : vector<8x128xf32> to vector<8x32xf32>
    %17 = arith.negf %16 : vector<8x32xf32>
    %18 = math.exp %17 : vector<8x32xf32>
    %cst_14 = arith.constant 1.000000e+00 : f32
    %19 = vector.broadcast %cst_14 : f32 to vector<8x32xf32>
    %20 = arith.addf %19, %18 : vector<8x32xf32>
    %21 = arith.divf %19, %20 : vector<8x32xf32>
    %22 = vector.extract_strided_slice %15 {offsets = [0, 32], sizes = [8, 32], strides = [1, 1]} : vector<8x128xf32> to vector<8x32xf32>
    %23 = arith.negf %22 : vector<8x32xf32>
    %24 = math.exp %23 : vector<8x32xf32>
    %cst_15 = arith.constant 1.000000e+00 : f32
    %25 = vector.broadcast %cst_15 : f32 to vector<8x32xf32>
    %26 = arith.addf %25, %24 : vector<8x32xf32>
    %27 = arith.divf %25, %26 : vector<8x32xf32>
    %28 = vector.extract_strided_slice %15 {offsets = [0, 64], sizes = [8, 32], strides = [1, 1]} : vector<8x128xf32> to vector<8x32xf32>
    %29 = math.tanh %28 : vector<8x32xf32>
    %30 = vector.extract_strided_slice %15 {offsets = [0, 96], sizes = [8, 32], strides = [1, 1]} : vector<8x128xf32> to vector<8x32xf32>
    %31 = arith.negf %30 : vector<8x32xf32>
    %32 = math.exp %31 : vector<8x32xf32>
    %cst_16 = arith.constant 1.000000e+00 : f32
    %33 = vector.broadcast %cst_16 : f32 to vector<8x32xf32>
    %34 = arith.addf %33, %32 : vector<8x32xf32>
    %35 = arith.divf %33, %34 : vector<8x32xf32>
    %36 = arith.mulf %27, %11 : vector<8x32xf32>
    %37 = arith.mulf %21, %29 : vector<8x32xf32>
    %38 = arith.addf %36, %37 : vector<8x32xf32>
    %39 = math.tanh %38 : vector<8x32xf32>
    %40 = arith.mulf %35, %39 : vector<8x32xf32>
    %41 = vector.extract_strided_slice %10 {offsets = [8, 0], sizes = [8, 128], strides = [1, 1]} : vector<64x128xf32> to vector<8x128xf32>
    %cst_17 = arith.constant dense<0.000000e+00> : vector<8x128xf32>
    %42 = tpu.matmul %40, %12, %cst_17 {dimension_numbers = #tpu.dot_dimension_numbers<[1], [0], [0], [1], [0, 0, 1, 1], [], []>} : vector<8x32xf32>, vector<32x128xf32>, vector<8x128xf32> -> vector<8x128xf32>
    %43 = arith.addf %41, %42 : vector<8x128xf32>
    %44 = vector.extract_strided_slice %43 {offsets = [0, 0], sizes = [8, 32], strides = [1, 1]} : vector<8x128xf32> to vector<8x32xf32>
    %45 = arith.negf %44 : vector<8x32xf32>
    %46 = math.exp %45 : vector<8x32xf32>
    %cst_18 = arith.constant 1.000000e+00 : f32
    %47 = vector.broadcast %cst_18 : f32 to vector<8x32xf32>
    %48 = arith.addf %47, %46 : vector<8x32xf32>
    %49 = arith.divf %47, %48 : vector<8x32xf32>
    %50 = vector.extract_strided_slice %43 {offsets = [0, 32], sizes = [8, 32], strides = [1, 1]} : vector<8x128xf32> to vector<8x32xf32>
    %51 = arith.negf %50 : vector<8x32xf32>
    %52 = math.exp %51 : vector<8x32xf32>
    %cst_19 = arith.constant 1.000000e+00 : f32
    %53 = vector.broadcast %cst_19 : f32 to vector<8x32xf32>
    %54 = arith.addf %53, %52 : vector<8x32xf32>
    %55 = arith.divf %53, %54 : vector<8x32xf32>
    %56 = vector.extract_strided_slice %43 {offsets = [0, 64], sizes = [8, 32], strides = [1, 1]} : vector<8x128xf32> to vector<8x32xf32>
    %57 = math.tanh %56 : vector<8x32xf32>
    %58 = vector.extract_strided_slice %43 {offsets = [0, 96], sizes = [8, 32], strides = [1, 1]} : vector<8x128xf32> to vector<8x32xf32>
    %59 = arith.negf %58 : vector<8x32xf32>
    %60 = math.exp %59 : vector<8x32xf32>
    %cst_20 = arith.constant 1.000000e+00 : f32
    %61 = vector.broadcast %cst_20 : f32 to vector<8x32xf32>
    %62 = arith.addf %61, %60 : vector<8x32xf32>
    %63 = arith.divf %61, %62 : vector<8x32xf32>
    %64 = arith.mulf %55, %38 : vector<8x32xf32>
    %65 = arith.mulf %49, %57 : vector<8x32xf32>
    %66 = arith.addf %64, %65 : vector<8x32xf32>
    %67 = math.tanh %66 : vector<8x32xf32>
    %68 = arith.mulf %63, %67 : vector<8x32xf32>
    %69 = vector.extract_strided_slice %10 {offsets = [16, 0], sizes = [8, 128], strides = [1, 1]} : vector<64x128xf32> to vector<8x128xf32>
    %cst_21 = arith.constant dense<0.000000e+00> : vector<8x128xf32>
    %70 = tpu.matmul %68, %12, %cst_21 {dimension_numbers = #tpu.dot_dimension_numbers<[1], [0], [0], [1], [0, 0, 1, 1], [], []>} : vector<8x32xf32>, vector<32x128xf32>, vector<8x128xf32> -> vector<8x128xf32>
    %71 = arith.addf %69, %70 : vector<8x128xf32>
    %72 = vector.extract_strided_slice %71 {offsets = [0, 0], sizes = [8, 32], strides = [1, 1]} : vector<8x128xf32> to vector<8x32xf32>
    %73 = arith.negf %72 : vector<8x32xf32>
    %74 = math.exp %73 : vector<8x32xf32>
    %cst_22 = arith.constant 1.000000e+00 : f32
    %75 = vector.broadcast %cst_22 : f32 to vector<8x32xf32>
    %76 = arith.addf %75, %74 : vector<8x32xf32>
    %77 = arith.divf %75, %76 : vector<8x32xf32>
    %78 = vector.extract_strided_slice %71 {offsets = [0, 32], sizes = [8, 32], strides = [1, 1]} : vector<8x128xf32> to vector<8x32xf32>
    %79 = arith.negf %78 : vector<8x32xf32>
    %80 = math.exp %79 : vector<8x32xf32>
    %cst_23 = arith.constant 1.000000e+00 : f32
    %81 = vector.broadcast %cst_23 : f32 to vector<8x32xf32>
    %82 = arith.addf %81, %80 : vector<8x32xf32>
    %83 = arith.divf %81, %82 : vector<8x32xf32>
    %84 = vector.extract_strided_slice %71 {offsets = [0, 64], sizes = [8, 32], strides = [1, 1]} : vector<8x128xf32> to vector<8x32xf32>
    %85 = math.tanh %84 : vector<8x32xf32>
    %86 = vector.extract_strided_slice %71 {offsets = [0, 96], sizes = [8, 32], strides = [1, 1]} : vector<8x128xf32> to vector<8x32xf32>
    %87 = arith.negf %86 : vector<8x32xf32>
    %88 = math.exp %87 : vector<8x32xf32>
    %cst_24 = arith.constant 1.000000e+00 : f32
    %89 = vector.broadcast %cst_24 : f32 to vector<8x32xf32>
    %90 = arith.addf %89, %88 : vector<8x32xf32>
    %91 = arith.divf %89, %90 : vector<8x32xf32>
    %92 = arith.mulf %83, %66 : vector<8x32xf32>
    %93 = arith.mulf %77, %85 : vector<8x32xf32>
    %94 = arith.addf %92, %93 : vector<8x32xf32>
    %95 = math.tanh %94 : vector<8x32xf32>
    %96 = arith.mulf %91, %95 : vector<8x32xf32>
    %97 = vector.extract_strided_slice %10 {offsets = [24, 0], sizes = [8, 128], strides = [1, 1]} : vector<64x128xf32> to vector<8x128xf32>
    %cst_25 = arith.constant dense<0.000000e+00> : vector<8x128xf32>
    %98 = tpu.matmul %96, %12, %cst_25 {dimension_numbers = #tpu.dot_dimension_numbers<[1], [0], [0], [1], [0, 0, 1, 1], [], []>} : vector<8x32xf32>, vector<32x128xf32>, vector<8x128xf32> -> vector<8x128xf32>
    %99 = arith.addf %97, %98 : vector<8x128xf32>
    %100 = vector.extract_strided_slice %99 {offsets = [0, 0], sizes = [8, 32], strides = [1, 1]} : vector<8x128xf32> to vector<8x32xf32>
    %101 = arith.negf %100 : vector<8x32xf32>
    %102 = math.exp %101 : vector<8x32xf32>
    %cst_26 = arith.constant 1.000000e+00 : f32
    %103 = vector.broadcast %cst_26 : f32 to vector<8x32xf32>
    %104 = arith.addf %103, %102 : vector<8x32xf32>
    %105 = arith.divf %103, %104 : vector<8x32xf32>
    %106 = vector.extract_strided_slice %99 {offsets = [0, 32], sizes = [8, 32], strides = [1, 1]} : vector<8x128xf32> to vector<8x32xf32>
    %107 = arith.negf %106 : vector<8x32xf32>
    %108 = math.exp %107 : vector<8x32xf32>
    %cst_27 = arith.constant 1.000000e+00 : f32
    %109 = vector.broadcast %cst_27 : f32 to vector<8x32xf32>
    %110 = arith.addf %109, %108 : vector<8x32xf32>
    %111 = arith.divf %109, %110 : vector<8x32xf32>
    %112 = vector.extract_strided_slice %99 {offsets = [0, 64], sizes = [8, 32], strides = [1, 1]} : vector<8x128xf32> to vector<8x32xf32>
    %113 = math.tanh %112 : vector<8x32xf32>
    %114 = vector.extract_strided_slice %99 {offsets = [0, 96], sizes = [8, 32], strides = [1, 1]} : vector<8x128xf32> to vector<8x32xf32>
    %115 = arith.negf %114 : vector<8x32xf32>
    %116 = math.exp %115 : vector<8x32xf32>
    %cst_28 = arith.constant 1.000000e+00 : f32
    %117 = vector.broadcast %cst_28 : f32 to vector<8x32xf32>
    %118 = arith.addf %117, %116 : vector<8x32xf32>
    %119 = arith.divf %117, %118 : vector<8x32xf32>
    %120 = arith.mulf %111, %94 : vector<8x32xf32>
    %121 = arith.mulf %105, %113 : vector<8x32xf32>
    %122 = arith.addf %120, %121 : vector<8x32xf32>
    %123 = math.tanh %122 : vector<8x32xf32>
    %124 = arith.mulf %119, %123 : vector<8x32xf32>
    %125 = vector.extract_strided_slice %10 {offsets = [32, 0], sizes = [8, 128], strides = [1, 1]} : vector<64x128xf32> to vector<8x128xf32>
    %cst_29 = arith.constant dense<0.000000e+00> : vector<8x128xf32>
    %126 = tpu.matmul %124, %12, %cst_29 {dimension_numbers = #tpu.dot_dimension_numbers<[1], [0], [0], [1], [0, 0, 1, 1], [], []>} : vector<8x32xf32>, vector<32x128xf32>, vector<8x128xf32> -> vector<8x128xf32>
    %127 = arith.addf %125, %126 : vector<8x128xf32>
    %128 = vector.extract_strided_slice %127 {offsets = [0, 0], sizes = [8, 32], strides = [1, 1]} : vector<8x128xf32> to vector<8x32xf32>
    %129 = arith.negf %128 : vector<8x32xf32>
    %130 = math.exp %129 : vector<8x32xf32>
    %cst_30 = arith.constant 1.000000e+00 : f32
    %131 = vector.broadcast %cst_30 : f32 to vector<8x32xf32>
    %132 = arith.addf %131, %130 : vector<8x32xf32>
    %133 = arith.divf %131, %132 : vector<8x32xf32>
    %134 = vector.extract_strided_slice %127 {offsets = [0, 32], sizes = [8, 32], strides = [1, 1]} : vector<8x128xf32> to vector<8x32xf32>
    %135 = arith.negf %134 : vector<8x32xf32>
    %136 = math.exp %135 : vector<8x32xf32>
    %cst_31 = arith.constant 1.000000e+00 : f32
    %137 = vector.broadcast %cst_31 : f32 to vector<8x32xf32>
    %138 = arith.addf %137, %136 : vector<8x32xf32>
    %139 = arith.divf %137, %138 : vector<8x32xf32>
    %140 = vector.extract_strided_slice %127 {offsets = [0, 64], sizes = [8, 32], strides = [1, 1]} : vector<8x128xf32> to vector<8x32xf32>
    %141 = math.tanh %140 : vector<8x32xf32>
    %142 = vector.extract_strided_slice %127 {offsets = [0, 96], sizes = [8, 32], strides = [1, 1]} : vector<8x128xf32> to vector<8x32xf32>
    %143 = arith.negf %142 : vector<8x32xf32>
    %144 = math.exp %143 : vector<8x32xf32>
    %cst_32 = arith.constant 1.000000e+00 : f32
    %145 = vector.broadcast %cst_32 : f32 to vector<8x32xf32>
    %146 = arith.addf %145, %144 : vector<8x32xf32>
    %147 = arith.divf %145, %146 : vector<8x32xf32>
    %148 = arith.mulf %139, %122 : vector<8x32xf32>
    %149 = arith.mulf %133, %141 : vector<8x32xf32>
    %150 = arith.addf %148, %149 : vector<8x32xf32>
    %151 = math.tanh %150 : vector<8x32xf32>
    %152 = arith.mulf %147, %151 : vector<8x32xf32>
    %153 = vector.extract_strided_slice %10 {offsets = [40, 0], sizes = [8, 128], strides = [1, 1]} : vector<64x128xf32> to vector<8x128xf32>
    %cst_33 = arith.constant dense<0.000000e+00> : vector<8x128xf32>
    %154 = tpu.matmul %152, %12, %cst_33 {dimension_numbers = #tpu.dot_dimension_numbers<[1], [0], [0], [1], [0, 0, 1, 1], [], []>} : vector<8x32xf32>, vector<32x128xf32>, vector<8x128xf32> -> vector<8x128xf32>
    %155 = arith.addf %153, %154 : vector<8x128xf32>
    %156 = vector.extract_strided_slice %155 {offsets = [0, 0], sizes = [8, 32], strides = [1, 1]} : vector<8x128xf32> to vector<8x32xf32>
    %157 = arith.negf %156 : vector<8x32xf32>
    %158 = math.exp %157 : vector<8x32xf32>
    %cst_34 = arith.constant 1.000000e+00 : f32
    %159 = vector.broadcast %cst_34 : f32 to vector<8x32xf32>
    %160 = arith.addf %159, %158 : vector<8x32xf32>
    %161 = arith.divf %159, %160 : vector<8x32xf32>
    %162 = vector.extract_strided_slice %155 {offsets = [0, 32], sizes = [8, 32], strides = [1, 1]} : vector<8x128xf32> to vector<8x32xf32>
    %163 = arith.negf %162 : vector<8x32xf32>
    %164 = math.exp %163 : vector<8x32xf32>
    %cst_35 = arith.constant 1.000000e+00 : f32
    %165 = vector.broadcast %cst_35 : f32 to vector<8x32xf32>
    %166 = arith.addf %165, %164 : vector<8x32xf32>
    %167 = arith.divf %165, %166 : vector<8x32xf32>
    %168 = vector.extract_strided_slice %155 {offsets = [0, 64], sizes = [8, 32], strides = [1, 1]} : vector<8x128xf32> to vector<8x32xf32>
    %169 = math.tanh %168 : vector<8x32xf32>
    %170 = vector.extract_strided_slice %155 {offsets = [0, 96], sizes = [8, 32], strides = [1, 1]} : vector<8x128xf32> to vector<8x32xf32>
    %171 = arith.negf %170 : vector<8x32xf32>
    %172 = math.exp %171 : vector<8x32xf32>
    %cst_36 = arith.constant 1.000000e+00 : f32
    %173 = vector.broadcast %cst_36 : f32 to vector<8x32xf32>
    %174 = arith.addf %173, %172 : vector<8x32xf32>
    %175 = arith.divf %173, %174 : vector<8x32xf32>
    %176 = arith.mulf %167, %150 : vector<8x32xf32>
    %177 = arith.mulf %161, %169 : vector<8x32xf32>
    %178 = arith.addf %176, %177 : vector<8x32xf32>
    %179 = math.tanh %178 : vector<8x32xf32>
    %180 = arith.mulf %175, %179 : vector<8x32xf32>
    %181 = vector.extract_strided_slice %10 {offsets = [48, 0], sizes = [8, 128], strides = [1, 1]} : vector<64x128xf32> to vector<8x128xf32>
    %cst_37 = arith.constant dense<0.000000e+00> : vector<8x128xf32>
    %182 = tpu.matmul %180, %12, %cst_37 {dimension_numbers = #tpu.dot_dimension_numbers<[1], [0], [0], [1], [0, 0, 1, 1], [], []>} : vector<8x32xf32>, vector<32x128xf32>, vector<8x128xf32> -> vector<8x128xf32>
    %183 = arith.addf %181, %182 : vector<8x128xf32>
    %184 = vector.extract_strided_slice %183 {offsets = [0, 0], sizes = [8, 32], strides = [1, 1]} : vector<8x128xf32> to vector<8x32xf32>
    %185 = arith.negf %184 : vector<8x32xf32>
    %186 = math.exp %185 : vector<8x32xf32>
    %cst_38 = arith.constant 1.000000e+00 : f32
    %187 = vector.broadcast %cst_38 : f32 to vector<8x32xf32>
    %188 = arith.addf %187, %186 : vector<8x32xf32>
    %189 = arith.divf %187, %188 : vector<8x32xf32>
    %190 = vector.extract_strided_slice %183 {offsets = [0, 32], sizes = [8, 32], strides = [1, 1]} : vector<8x128xf32> to vector<8x32xf32>
    %191 = arith.negf %190 : vector<8x32xf32>
    %192 = math.exp %191 : vector<8x32xf32>
    %cst_39 = arith.constant 1.000000e+00 : f32
    %193 = vector.broadcast %cst_39 : f32 to vector<8x32xf32>
    %194 = arith.addf %193, %192 : vector<8x32xf32>
    %195 = arith.divf %193, %194 : vector<8x32xf32>
    %196 = vector.extract_strided_slice %183 {offsets = [0, 64], sizes = [8, 32], strides = [1, 1]} : vector<8x128xf32> to vector<8x32xf32>
    %197 = math.tanh %196 : vector<8x32xf32>
    %198 = vector.extract_strided_slice %183 {offsets = [0, 96], sizes = [8, 32], strides = [1, 1]} : vector<8x128xf32> to vector<8x32xf32>
    %199 = arith.negf %198 : vector<8x32xf32>
    %200 = math.exp %199 : vector<8x32xf32>
    %cst_40 = arith.constant 1.000000e+00 : f32
    %201 = vector.broadcast %cst_40 : f32 to vector<8x32xf32>
    %202 = arith.addf %201, %200 : vector<8x32xf32>
    %203 = arith.divf %201, %202 : vector<8x32xf32>
    %204 = arith.mulf %195, %178 : vector<8x32xf32>
    %205 = arith.mulf %189, %197 : vector<8x32xf32>
    %206 = arith.addf %204, %205 : vector<8x32xf32>
    %207 = math.tanh %206 : vector<8x32xf32>
    %208 = arith.mulf %203, %207 : vector<8x32xf32>
    %209 = vector.extract_strided_slice %10 {offsets = [56, 0], sizes = [8, 128], strides = [1, 1]} : vector<64x128xf32> to vector<8x128xf32>
    %cst_41 = arith.constant dense<0.000000e+00> : vector<8x128xf32>
    %210 = tpu.matmul %208, %12, %cst_41 {dimension_numbers = #tpu.dot_dimension_numbers<[1], [0], [0], [1], [0, 0, 1, 1], [], []>} : vector<8x32xf32>, vector<32x128xf32>, vector<8x128xf32> -> vector<8x128xf32>
    %211 = arith.addf %209, %210 : vector<8x128xf32>
    %212 = vector.extract_strided_slice %211 {offsets = [0, 0], sizes = [8, 32], strides = [1, 1]} : vector<8x128xf32> to vector<8x32xf32>
    %213 = arith.negf %212 : vector<8x32xf32>
    %214 = math.exp %213 : vector<8x32xf32>
    %cst_42 = arith.constant 1.000000e+00 : f32
    %215 = vector.broadcast %cst_42 : f32 to vector<8x32xf32>
    %216 = arith.addf %215, %214 : vector<8x32xf32>
    %217 = arith.divf %215, %216 : vector<8x32xf32>
    %218 = vector.extract_strided_slice %211 {offsets = [0, 32], sizes = [8, 32], strides = [1, 1]} : vector<8x128xf32> to vector<8x32xf32>
    %219 = arith.negf %218 : vector<8x32xf32>
    %220 = math.exp %219 : vector<8x32xf32>
    %cst_43 = arith.constant 1.000000e+00 : f32
    %221 = vector.broadcast %cst_43 : f32 to vector<8x32xf32>
    %222 = arith.addf %221, %220 : vector<8x32xf32>
    %223 = arith.divf %221, %222 : vector<8x32xf32>
    %224 = vector.extract_strided_slice %211 {offsets = [0, 64], sizes = [8, 32], strides = [1, 1]} : vector<8x128xf32> to vector<8x32xf32>
    %225 = math.tanh %224 : vector<8x32xf32>
    %226 = vector.extract_strided_slice %211 {offsets = [0, 96], sizes = [8, 32], strides = [1, 1]} : vector<8x128xf32> to vector<8x32xf32>
    %227 = arith.negf %226 : vector<8x32xf32>
    %228 = math.exp %227 : vector<8x32xf32>
    %cst_44 = arith.constant 1.000000e+00 : f32
    %229 = vector.broadcast %cst_44 : f32 to vector<8x32xf32>
    %230 = arith.addf %229, %228 : vector<8x32xf32>
    %231 = arith.divf %229, %230 : vector<8x32xf32>
    %232 = arith.mulf %223, %206 : vector<8x32xf32>
    %233 = arith.mulf %217, %225 : vector<8x32xf32>
    %234 = arith.addf %232, %233 : vector<8x32xf32>
    %235 = math.tanh %234 : vector<8x32xf32>
    %236 = arith.mulf %231, %235 : vector<8x32xf32>
    %c0_45 = arith.constant 0 : index
    %c0_46 = arith.constant 0 : index
    %237 = vector.load %arg7[%c0_45, %c0_46] : memref<32x16xf32, #tpu.memory_space<vmem>>, vector<32x16xf32>
    %cst_47 = arith.constant dense<0.000000e+00> : vector<8x16xf32>
    %238 = tpu.matmul %236, %237, %cst_47 {dimension_numbers = #tpu.dot_dimension_numbers<[1], [0], [0], [1], [0, 0, 1, 1], [], []>} : vector<8x32xf32>, vector<32x16xf32>, vector<8x16xf32> -> vector<8x16xf32>
    %c0_48 = arith.constant 0 : index
    %c0_49 = arith.constant 0 : index
    %239 = vector.load %arg8[%c0_48, %c0_49] : memref<1x16xf32, #tpu.memory_space<vmem>>, vector<1x16xf32>
    %240 = vector.broadcast %239 : vector<1x16xf32> to vector<8x16xf32>
    %241 = arith.addf %238, %240 : vector<8x16xf32>
    %c0_50 = arith.constant 0 : index
    %c0_51 = arith.constant 0 : index
    %242 = vector.load %arg9[%c0_50, %c0_51] : memref<32x16xf32, #tpu.memory_space<vmem>>, vector<32x16xf32>
    %cst_52 = arith.constant dense<0.000000e+00> : vector<8x16xf32>
    %243 = tpu.matmul %236, %242, %cst_52 {dimension_numbers = #tpu.dot_dimension_numbers<[1], [0], [0], [1], [0, 0, 1, 1], [], []>} : vector<8x32xf32>, vector<32x16xf32>, vector<8x16xf32> -> vector<8x16xf32>
    %c0_53 = arith.constant 0 : index
    %c0_54 = arith.constant 0 : index
    %244 = vector.load %arg10[%c0_53, %c0_54] : memref<1x16xf32, #tpu.memory_space<vmem>>, vector<1x16xf32>
    %245 = vector.broadcast %244 : vector<1x16xf32> to vector<8x16xf32>
    %246 = arith.addf %243, %245 : vector<8x16xf32>
    %c0_55 = arith.constant 0 : index
    %c0_56 = arith.constant 0 : index
    %247 = vector.load %arg20[%c0_55, %c0_56] : memref<8x16xf32, #tpu.memory_space<vmem>>, vector<8x16xf32>
    tpu.vector_store %arg20[%c0_55, %c0_56], %241 {strides = array<i32>} : memref<8x16xf32, #tpu.memory_space<vmem>>, vector<8x16xf32>,
    %c0_57 = arith.constant 0 : index
    %c0_58 = arith.constant 0 : index
    %248 = vector.load %arg21[%c0_57, %c0_58] : memref<8x16xf32, #tpu.memory_space<vmem>>, vector<8x16xf32>
    tpu.vector_store %arg21[%c0_57, %c0_58], %246 {strides = array<i32>} : memref<8x16xf32, #tpu.memory_space<vmem>>, vector<8x16xf32>,
    %c0_59 = arith.constant 0 : index
    %c0_60 = arith.constant 0 : index
    %249 = vector.load %arg2[%c0_59, %c0_60] : memref<8x16xf32, #tpu.memory_space<vmem>>, vector<8x16xf32>
    %cst_61 = arith.constant 5.000000e-01 : f32
    %250 = vector.broadcast %cst_61 : f32 to vector<8x16xf32>
    %251 = arith.mulf %250, %246 : vector<8x16xf32>
    %252 = math.exp %251 : vector<8x16xf32>
    %253 = arith.mulf %249, %252 : vector<8x16xf32>
    %254 = arith.addf %241, %253 : vector<8x16xf32>
    %c0_62 = arith.constant 0 : index
    %c0_63 = arith.constant 0 : index
    %255 = vector.load %arg11[%c0_62, %c0_63] : memref<16x32xf32, #tpu.memory_space<vmem>>, vector<16x32xf32>
    %cst_64 = arith.constant dense<0.000000e+00> : vector<8x32xf32>
    %256 = tpu.matmul %254, %255, %cst_64 {dimension_numbers = #tpu.dot_dimension_numbers<[1], [0], [0], [1], [0, 0, 1, 1], [], []>} : vector<8x16xf32>, vector<16x32xf32>, vector<8x32xf32> -> vector<8x32xf32>
    %c0_65 = arith.constant 0 : index
    %c0_66 = arith.constant 0 : index
    %257 = vector.load %arg12[%c0_65, %c0_66] : memref<32x32xf32, #tpu.memory_space<vmem>>, vector<32x32xf32>
    %cst_67 = arith.constant dense<0.000000e+00> : vector<8x32xf32>
    %258 = tpu.matmul %1, %257, %cst_67 {dimension_numbers = #tpu.dot_dimension_numbers<[1], [0], [0], [1], [0, 0, 1, 1], [], []>} : vector<8x32xf32>, vector<32x32xf32>, vector<8x32xf32> -> vector<8x32xf32>
    %259 = arith.addf %256, %258 : vector<8x32xf32>
    %c0_68 = arith.constant 0 : index
    %c0_69 = arith.constant 0 : index
    %260 = vector.load %arg13[%c0_68, %c0_69] : memref<1x32xf32, #tpu.memory_space<vmem>>, vector<1x32xf32>
    %261 = vector.broadcast %260 : vector<1x32xf32> to vector<8x32xf32>
    %262 = arith.addf %259, %261 : vector<8x32xf32>
    %cst_70 = arith.constant 0.000000e+00 : f32
    %263 = vector.broadcast %cst_70 : f32 to vector<8x32xf32>
    %c0_71 = arith.constant 0 : index
    %c0_72 = arith.constant 0 : index
    %264 = vector.load %arg14[%c0_71, %c0_72] : memref<32x128xf32, #tpu.memory_space<vmem>>, vector<32x128xf32>
    %cst_73 = arith.constant dense<0.000000e+00> : vector<64x128xf32>
    %265 = tpu.matmul %0, %264, %cst_73 {dimension_numbers = #tpu.dot_dimension_numbers<[1], [0], [0], [1], [0, 0, 1, 1], [], []>} : vector<64x32xf32>, vector<32x128xf32>, vector<64x128xf32> -> vector<64x128xf32>
    %c0_74 = arith.constant 0 : index
    %c0_75 = arith.constant 0 : index
    %266 = vector.load %arg15[%c0_74, %c0_75] : memref<1x128xf32, #tpu.memory_space<vmem>>, vector<1x128xf32>
    %267 = vector.broadcast %266 : vector<1x128xf32> to vector<64x128xf32>
    %268 = arith.addf %265, %267 : vector<64x128xf32>
    %c0_76 = arith.constant 0 : index
    %c0_77 = arith.constant 0 : index
    %269 = vector.load %arg16[%c0_76, %c0_77] : memref<32x128xf32, #tpu.memory_space<vmem>>, vector<32x128xf32>
    %270 = vector.extract_strided_slice %268 {offsets = [0, 0], sizes = [8, 128], strides = [1, 1]} : vector<64x128xf32> to vector<8x128xf32>
    %cst_78 = arith.constant dense<0.000000e+00> : vector<8x128xf32>
    %271 = tpu.matmul %262, %269, %cst_78 {dimension_numbers = #tpu.dot_dimension_numbers<[1], [0], [0], [1], [0, 0, 1, 1], [], []>} : vector<8x32xf32>, vector<32x128xf32>, vector<8x128xf32> -> vector<8x128xf32>
    %272 = arith.addf %270, %271 : vector<8x128xf32>
    %273 = vector.extract_strided_slice %272 {offsets = [0, 0], sizes = [8, 32], strides = [1, 1]} : vector<8x128xf32> to vector<8x32xf32>
    %274 = arith.negf %273 : vector<8x32xf32>
    %275 = math.exp %274 : vector<8x32xf32>
    %cst_79 = arith.constant 1.000000e+00 : f32
    %276 = vector.broadcast %cst_79 : f32 to vector<8x32xf32>
    %277 = arith.addf %276, %275 : vector<8x32xf32>
    %278 = arith.divf %276, %277 : vector<8x32xf32>
    %279 = vector.extract_strided_slice %272 {offsets = [0, 32], sizes = [8, 32], strides = [1, 1]} : vector<8x128xf32> to vector<8x32xf32>
    %280 = arith.negf %279 : vector<8x32xf32>
    %281 = math.exp %280 : vector<8x32xf32>
    %cst_80 = arith.constant 1.000000e+00 : f32
    %282 = vector.broadcast %cst_80 : f32 to vector<8x32xf32>
    %283 = arith.addf %282, %281 : vector<8x32xf32>
    %284 = arith.divf %282, %283 : vector<8x32xf32>
    %285 = vector.extract_strided_slice %272 {offsets = [0, 64], sizes = [8, 32], strides = [1, 1]} : vector<8x128xf32> to vector<8x32xf32>
    %286 = math.tanh %285 : vector<8x32xf32>
    %287 = vector.extract_strided_slice %272 {offsets = [0, 96], sizes = [8, 32], strides = [1, 1]} : vector<8x128xf32> to vector<8x32xf32>
    %288 = arith.negf %287 : vector<8x32xf32>
    %289 = math.exp %288 : vector<8x32xf32>
    %cst_81 = arith.constant 1.000000e+00 : f32
    %290 = vector.broadcast %cst_81 : f32 to vector<8x32xf32>
    %291 = arith.addf %290, %289 : vector<8x32xf32>
    %292 = arith.divf %290, %291 : vector<8x32xf32>
    %293 = arith.mulf %284, %263 : vector<8x32xf32>
    %294 = arith.mulf %278, %286 : vector<8x32xf32>
    %295 = arith.addf %293, %294 : vector<8x32xf32>
    %296 = math.tanh %295 : vector<8x32xf32>
    %297 = arith.mulf %292, %296 : vector<8x32xf32>
    %c0_82 = arith.constant 0 : index
    %c0_83 = arith.constant 0 : index
    %298 = vector.load %arg22[%c0_82, %c0_83] : memref<64x32xf32, #tpu.memory_space<vmem>>, vector<8x32xf32>
    tpu.vector_store %arg22[%c0_82, %c0_83], %297 {strides = array<i32>} : memref<64x32xf32, #tpu.memory_space<vmem>>, vector<8x32xf32>,
    %299 = vector.extract_strided_slice %268 {offsets = [8, 0], sizes = [8, 128], strides = [1, 1]} : vector<64x128xf32> to vector<8x128xf32>
    %cst_84 = arith.constant dense<0.000000e+00> : vector<8x128xf32>
    %300 = tpu.matmul %297, %269, %cst_84 {dimension_numbers = #tpu.dot_dimension_numbers<[1], [0], [0], [1], [0, 0, 1, 1], [], []>} : vector<8x32xf32>, vector<32x128xf32>, vector<8x128xf32> -> vector<8x128xf32>
    %301 = arith.addf %299, %300 : vector<8x128xf32>
    %302 = vector.extract_strided_slice %301 {offsets = [0, 0], sizes = [8, 32], strides = [1, 1]} : vector<8x128xf32> to vector<8x32xf32>
    %303 = arith.negf %302 : vector<8x32xf32>
    %304 = math.exp %303 : vector<8x32xf32>
    %cst_85 = arith.constant 1.000000e+00 : f32
    %305 = vector.broadcast %cst_85 : f32 to vector<8x32xf32>
    %306 = arith.addf %305, %304 : vector<8x32xf32>
    %307 = arith.divf %305, %306 : vector<8x32xf32>
    %308 = vector.extract_strided_slice %301 {offsets = [0, 32], sizes = [8, 32], strides = [1, 1]} : vector<8x128xf32> to vector<8x32xf32>
    %309 = arith.negf %308 : vector<8x32xf32>
    %310 = math.exp %309 : vector<8x32xf32>
    %cst_86 = arith.constant 1.000000e+00 : f32
    %311 = vector.broadcast %cst_86 : f32 to vector<8x32xf32>
    %312 = arith.addf %311, %310 : vector<8x32xf32>
    %313 = arith.divf %311, %312 : vector<8x32xf32>
    %314 = vector.extract_strided_slice %301 {offsets = [0, 64], sizes = [8, 32], strides = [1, 1]} : vector<8x128xf32> to vector<8x32xf32>
    %315 = math.tanh %314 : vector<8x32xf32>
    %316 = vector.extract_strided_slice %301 {offsets = [0, 96], sizes = [8, 32], strides = [1, 1]} : vector<8x128xf32> to vector<8x32xf32>
    %317 = arith.negf %316 : vector<8x32xf32>
    %318 = math.exp %317 : vector<8x32xf32>
    %cst_87 = arith.constant 1.000000e+00 : f32
    %319 = vector.broadcast %cst_87 : f32 to vector<8x32xf32>
    %320 = arith.addf %319, %318 : vector<8x32xf32>
    %321 = arith.divf %319, %320 : vector<8x32xf32>
    %322 = arith.mulf %313, %295 : vector<8x32xf32>
    %323 = arith.mulf %307, %315 : vector<8x32xf32>
    %324 = arith.addf %322, %323 : vector<8x32xf32>
    %325 = math.tanh %324 : vector<8x32xf32>
    %326 = arith.mulf %321, %325 : vector<8x32xf32>
    %c8 = arith.constant 8 : index
    %c0_88 = arith.constant 0 : index
    %327 = vector.load %arg22[%c8, %c0_88] : memref<64x32xf32, #tpu.memory_space<vmem>>, vector<8x32xf32>
    tpu.vector_store %arg22[%c8, %c0_88], %326 {strides = array<i32>} : memref<64x32xf32, #tpu.memory_space<vmem>>, vector<8x32xf32>,
    %328 = vector.extract_strided_slice %268 {offsets = [16, 0], sizes = [8, 128], strides = [1, 1]} : vector<64x128xf32> to vector<8x128xf32>
    %cst_89 = arith.constant dense<0.000000e+00> : vector<8x128xf32>
    %329 = tpu.matmul %326, %269, %cst_89 {dimension_numbers = #tpu.dot_dimension_numbers<[1], [0], [0], [1], [0, 0, 1, 1], [], []>} : vector<8x32xf32>, vector<32x128xf32>, vector<8x128xf32> -> vector<8x128xf32>
    %330 = arith.addf %328, %329 : vector<8x128xf32>
    %331 = vector.extract_strided_slice %330 {offsets = [0, 0], sizes = [8, 32], strides = [1, 1]} : vector<8x128xf32> to vector<8x32xf32>
    %332 = arith.negf %331 : vector<8x32xf32>
    %333 = math.exp %332 : vector<8x32xf32>
    %cst_90 = arith.constant 1.000000e+00 : f32
    %334 = vector.broadcast %cst_90 : f32 to vector<8x32xf32>
    %335 = arith.addf %334, %333 : vector<8x32xf32>
    %336 = arith.divf %334, %335 : vector<8x32xf32>
    %337 = vector.extract_strided_slice %330 {offsets = [0, 32], sizes = [8, 32], strides = [1, 1]} : vector<8x128xf32> to vector<8x32xf32>
    %338 = arith.negf %337 : vector<8x32xf32>
    %339 = math.exp %338 : vector<8x32xf32>
    %cst_91 = arith.constant 1.000000e+00 : f32
    %340 = vector.broadcast %cst_91 : f32 to vector<8x32xf32>
    %341 = arith.addf %340, %339 : vector<8x32xf32>
    %342 = arith.divf %340, %341 : vector<8x32xf32>
    %343 = vector.extract_strided_slice %330 {offsets = [0, 64], sizes = [8, 32], strides = [1, 1]} : vector<8x128xf32> to vector<8x32xf32>
    %344 = math.tanh %343 : vector<8x32xf32>
    %345 = vector.extract_strided_slice %330 {offsets = [0, 96], sizes = [8, 32], strides = [1, 1]} : vector<8x128xf32> to vector<8x32xf32>
    %346 = arith.negf %345 : vector<8x32xf32>
    %347 = math.exp %346 : vector<8x32xf32>
    %cst_92 = arith.constant 1.000000e+00 : f32
    %348 = vector.broadcast %cst_92 : f32 to vector<8x32xf32>
    %349 = arith.addf %348, %347 : vector<8x32xf32>
    %350 = arith.divf %348, %349 : vector<8x32xf32>
    %351 = arith.mulf %342, %324 : vector<8x32xf32>
    %352 = arith.mulf %336, %344 : vector<8x32xf32>
    %353 = arith.addf %351, %352 : vector<8x32xf32>
    %354 = math.tanh %353 : vector<8x32xf32>
    %355 = arith.mulf %350, %354 : vector<8x32xf32>
    %c16 = arith.constant 16 : index
    %c0_93 = arith.constant 0 : index
    %356 = vector.load %arg22[%c16, %c0_93] : memref<64x32xf32, #tpu.memory_space<vmem>>, vector<8x32xf32>
    tpu.vector_store %arg22[%c16, %c0_93], %355 {strides = array<i32>} : memref<64x32xf32, #tpu.memory_space<vmem>>, vector<8x32xf32>,
    %357 = vector.extract_strided_slice %268 {offsets = [24, 0], sizes = [8, 128], strides = [1, 1]} : vector<64x128xf32> to vector<8x128xf32>
    %cst_94 = arith.constant dense<0.000000e+00> : vector<8x128xf32>
    %358 = tpu.matmul %355, %269, %cst_94 {dimension_numbers = #tpu.dot_dimension_numbers<[1], [0], [0], [1], [0, 0, 1, 1], [], []>} : vector<8x32xf32>, vector<32x128xf32>, vector<8x128xf32> -> vector<8x128xf32>
    %359 = arith.addf %357, %358 : vector<8x128xf32>
    %360 = vector.extract_strided_slice %359 {offsets = [0, 0], sizes = [8, 32], strides = [1, 1]} : vector<8x128xf32> to vector<8x32xf32>
    %361 = arith.negf %360 : vector<8x32xf32>
    %362 = math.exp %361 : vector<8x32xf32>
    %cst_95 = arith.constant 1.000000e+00 : f32
    %363 = vector.broadcast %cst_95 : f32 to vector<8x32xf32>
    %364 = arith.addf %363, %362 : vector<8x32xf32>
    %365 = arith.divf %363, %364 : vector<8x32xf32>
    %366 = vector.extract_strided_slice %359 {offsets = [0, 32], sizes = [8, 32], strides = [1, 1]} : vector<8x128xf32> to vector<8x32xf32>
    %367 = arith.negf %366 : vector<8x32xf32>
    %368 = math.exp %367 : vector<8x32xf32>
    %cst_96 = arith.constant 1.000000e+00 : f32
    %369 = vector.broadcast %cst_96 : f32 to vector<8x32xf32>
    %370 = arith.addf %369, %368 : vector<8x32xf32>
    %371 = arith.divf %369, %370 : vector<8x32xf32>
    %372 = vector.extract_strided_slice %359 {offsets = [0, 64], sizes = [8, 32], strides = [1, 1]} : vector<8x128xf32> to vector<8x32xf32>
    %373 = math.tanh %372 : vector<8x32xf32>
    %374 = vector.extract_strided_slice %359 {offsets = [0, 96], sizes = [8, 32], strides = [1, 1]} : vector<8x128xf32> to vector<8x32xf32>
    %375 = arith.negf %374 : vector<8x32xf32>
    %376 = math.exp %375 : vector<8x32xf32>
    %cst_97 = arith.constant 1.000000e+00 : f32
    %377 = vector.broadcast %cst_97 : f32 to vector<8x32xf32>
    %378 = arith.addf %377, %376 : vector<8x32xf32>
    %379 = arith.divf %377, %378 : vector<8x32xf32>
    %380 = arith.mulf %371, %353 : vector<8x32xf32>
    %381 = arith.mulf %365, %373 : vector<8x32xf32>
    %382 = arith.addf %380, %381 : vector<8x32xf32>
    %383 = math.tanh %382 : vector<8x32xf32>
    %384 = arith.mulf %379, %383 : vector<8x32xf32>
    %c24 = arith.constant 24 : index
    %c0_98 = arith.constant 0 : index
    %385 = vector.load %arg22[%c24, %c0_98] : memref<64x32xf32, #tpu.memory_space<vmem>>, vector<8x32xf32>
    tpu.vector_store %arg22[%c24, %c0_98], %384 {strides = array<i32>} : memref<64x32xf32, #tpu.memory_space<vmem>>, vector<8x32xf32>,
    %386 = vector.extract_strided_slice %268 {offsets = [32, 0], sizes = [8, 128], strides = [1, 1]} : vector<64x128xf32> to vector<8x128xf32>
    %cst_99 = arith.constant dense<0.000000e+00> : vector<8x128xf32>
    %387 = tpu.matmul %384, %269, %cst_99 {dimension_numbers = #tpu.dot_dimension_numbers<[1], [0], [0], [1], [0, 0, 1, 1], [], []>} : vector<8x32xf32>, vector<32x128xf32>, vector<8x128xf32> -> vector<8x128xf32>
    %388 = arith.addf %386, %387 : vector<8x128xf32>
    %389 = vector.extract_strided_slice %388 {offsets = [0, 0], sizes = [8, 32], strides = [1, 1]} : vector<8x128xf32> to vector<8x32xf32>
    %390 = arith.negf %389 : vector<8x32xf32>
    %391 = math.exp %390 : vector<8x32xf32>
    %cst_100 = arith.constant 1.000000e+00 : f32
    %392 = vector.broadcast %cst_100 : f32 to vector<8x32xf32>
    %393 = arith.addf %392, %391 : vector<8x32xf32>
    %394 = arith.divf %392, %393 : vector<8x32xf32>
    %395 = vector.extract_strided_slice %388 {offsets = [0, 32], sizes = [8, 32], strides = [1, 1]} : vector<8x128xf32> to vector<8x32xf32>
    %396 = arith.negf %395 : vector<8x32xf32>
    %397 = math.exp %396 : vector<8x32xf32>
    %cst_101 = arith.constant 1.000000e+00 : f32
    %398 = vector.broadcast %cst_101 : f32 to vector<8x32xf32>
    %399 = arith.addf %398, %397 : vector<8x32xf32>
    %400 = arith.divf %398, %399 : vector<8x32xf32>
    %401 = vector.extract_strided_slice %388 {offsets = [0, 64], sizes = [8, 32], strides = [1, 1]} : vector<8x128xf32> to vector<8x32xf32>
    %402 = math.tanh %401 : vector<8x32xf32>
    %403 = vector.extract_strided_slice %388 {offsets = [0, 96], sizes = [8, 32], strides = [1, 1]} : vector<8x128xf32> to vector<8x32xf32>
    %404 = arith.negf %403 : vector<8x32xf32>
    %405 = math.exp %404 : vector<8x32xf32>
    %cst_102 = arith.constant 1.000000e+00 : f32
    %406 = vector.broadcast %cst_102 : f32 to vector<8x32xf32>
    %407 = arith.addf %406, %405 : vector<8x32xf32>
    %408 = arith.divf %406, %407 : vector<8x32xf32>
    %409 = arith.mulf %400, %382 : vector<8x32xf32>
    %410 = arith.mulf %394, %402 : vector<8x32xf32>
    %411 = arith.addf %409, %410 : vector<8x32xf32>
    %412 = math.tanh %411 : vector<8x32xf32>
    %413 = arith.mulf %408, %412 : vector<8x32xf32>
    %c32 = arith.constant 32 : index
    %c0_103 = arith.constant 0 : index
    %414 = vector.load %arg22[%c32, %c0_103] : memref<64x32xf32, #tpu.memory_space<vmem>>, vector<8x32xf32>
    tpu.vector_store %arg22[%c32, %c0_103], %413 {strides = array<i32>} : memref<64x32xf32, #tpu.memory_space<vmem>>, vector<8x32xf32>,
    %415 = vector.extract_strided_slice %268 {offsets = [40, 0], sizes = [8, 128], strides = [1, 1]} : vector<64x128xf32> to vector<8x128xf32>
    %cst_104 = arith.constant dense<0.000000e+00> : vector<8x128xf32>
    %416 = tpu.matmul %413, %269, %cst_104 {dimension_numbers = #tpu.dot_dimension_numbers<[1], [0], [0], [1], [0, 0, 1, 1], [], []>} : vector<8x32xf32>, vector<32x128xf32>, vector<8x128xf32> -> vector<8x128xf32>
    %417 = arith.addf %415, %416 : vector<8x128xf32>
    %418 = vector.extract_strided_slice %417 {offsets = [0, 0], sizes = [8, 32], strides = [1, 1]} : vector<8x128xf32> to vector<8x32xf32>
    %419 = arith.negf %418 : vector<8x32xf32>
    %420 = math.exp %419 : vector<8x32xf32>
    %cst_105 = arith.constant 1.000000e+00 : f32
    %421 = vector.broadcast %cst_105 : f32 to vector<8x32xf32>
    %422 = arith.addf %421, %420 : vector<8x32xf32>
    %423 = arith.divf %421, %422 : vector<8x32xf32>
    %424 = vector.extract_strided_slice %417 {offsets = [0, 32], sizes = [8, 32], strides = [1, 1]} : vector<8x128xf32> to vector<8x32xf32>
    %425 = arith.negf %424 : vector<8x32xf32>
    %426 = math.exp %425 : vector<8x32xf32>
    %cst_106 = arith.constant 1.000000e+00 : f32
    %427 = vector.broadcast %cst_106 : f32 to vector<8x32xf32>
    %428 = arith.addf %427, %426 : vector<8x32xf32>
    %429 = arith.divf %427, %428 : vector<8x32xf32>
    %430 = vector.extract_strided_slice %417 {offsets = [0, 64], sizes = [8, 32], strides = [1, 1]} : vector<8x128xf32> to vector<8x32xf32>
    %431 = math.tanh %430 : vector<8x32xf32>
    %432 = vector.extract_strided_slice %417 {offsets = [0, 96], sizes = [8, 32], strides = [1, 1]} : vector<8x128xf32> to vector<8x32xf32>
    %433 = arith.negf %432 : vector<8x32xf32>
    %434 = math.exp %433 : vector<8x32xf32>
    %cst_107 = arith.constant 1.000000e+00 : f32
    %435 = vector.broadcast %cst_107 : f32 to vector<8x32xf32>
    %436 = arith.addf %435, %434 : vector<8x32xf32>
    %437 = arith.divf %435, %436 : vector<8x32xf32>
    %438 = arith.mulf %429, %411 : vector<8x32xf32>
    %439 = arith.mulf %423, %431 : vector<8x32xf32>
    %440 = arith.addf %438, %439 : vector<8x32xf32>
    %441 = math.tanh %440 : vector<8x32xf32>
    %442 = arith.mulf %437, %441 : vector<8x32xf32>
    %c40 = arith.constant 40 : index
    %c0_108 = arith.constant 0 : index
    %443 = vector.load %arg22[%c40, %c0_108] : memref<64x32xf32, #tpu.memory_space<vmem>>, vector<8x32xf32>
    tpu.vector_store %arg22[%c40, %c0_108], %442 {strides = array<i32>} : memref<64x32xf32, #tpu.memory_space<vmem>>, vector<8x32xf32>,
    %444 = vector.extract_strided_slice %268 {offsets = [48, 0], sizes = [8, 128], strides = [1, 1]} : vector<64x128xf32> to vector<8x128xf32>
    %cst_109 = arith.constant dense<0.000000e+00> : vector<8x128xf32>
    %445 = tpu.matmul %442, %269, %cst_109 {dimension_numbers = #tpu.dot_dimension_numbers<[1], [0], [0], [1], [0, 0, 1, 1], [], []>} : vector<8x32xf32>, vector<32x128xf32>, vector<8x128xf32> -> vector<8x128xf32>
    %446 = arith.addf %444, %445 : vector<8x128xf32>
    %447 = vector.extract_strided_slice %446 {offsets = [0, 0], sizes = [8, 32], strides = [1, 1]} : vector<8x128xf32> to vector<8x32xf32>
    %448 = arith.negf %447 : vector<8x32xf32>
    %449 = math.exp %448 : vector<8x32xf32>
    %cst_110 = arith.constant 1.000000e+00 : f32
    %450 = vector.broadcast %cst_110 : f32 to vector<8x32xf32>
    %451 = arith.addf %450, %449 : vector<8x32xf32>
    %452 = arith.divf %450, %451 : vector<8x32xf32>
    %453 = vector.extract_strided_slice %446 {offsets = [0, 32], sizes = [8, 32], strides = [1, 1]} : vector<8x128xf32> to vector<8x32xf32>
    %454 = arith.negf %453 : vector<8x32xf32>
    %455 = math.exp %454 : vector<8x32xf32>
    %cst_111 = arith.constant 1.000000e+00 : f32
    %456 = vector.broadcast %cst_111 : f32 to vector<8x32xf32>
    %457 = arith.addf %456, %455 : vector<8x32xf32>
    %458 = arith.divf %456, %457 : vector<8x32xf32>
    %459 = vector.extract_strided_slice %446 {offsets = [0, 64], sizes = [8, 32], strides = [1, 1]} : vector<8x128xf32> to vector<8x32xf32>
    %460 = math.tanh %459 : vector<8x32xf32>
    %461 = vector.extract_strided_slice %446 {offsets = [0, 96], sizes = [8, 32], strides = [1, 1]} : vector<8x128xf32> to vector<8x32xf32>
    %462 = arith.negf %461 : vector<8x32xf32>
    %463 = math.exp %462 : vector<8x32xf32>
    %cst_112 = arith.constant 1.000000e+00 : f32
    %464 = vector.broadcast %cst_112 : f32 to vector<8x32xf32>
    %465 = arith.addf %464, %463 : vector<8x32xf32>
    %466 = arith.divf %464, %465 : vector<8x32xf32>
    %467 = arith.mulf %458, %440 : vector<8x32xf32>
    %468 = arith.mulf %452, %460 : vector<8x32xf32>
    %469 = arith.addf %467, %468 : vector<8x32xf32>
    %470 = math.tanh %469 : vector<8x32xf32>
    %471 = arith.mulf %466, %470 : vector<8x32xf32>
    %c48 = arith.constant 48 : index
    %c0_113 = arith.constant 0 : index
    %472 = vector.load %arg22[%c48, %c0_113] : memref<64x32xf32, #tpu.memory_space<vmem>>, vector<8x32xf32>
    tpu.vector_store %arg22[%c48, %c0_113], %471 {strides = array<i32>} : memref<64x32xf32, #tpu.memory_space<vmem>>, vector<8x32xf32>,
    %473 = vector.extract_strided_slice %268 {offsets = [56, 0], sizes = [8, 128], strides = [1, 1]} : vector<64x128xf32> to vector<8x128xf32>
    %cst_114 = arith.constant dense<0.000000e+00> : vector<8x128xf32>
    %474 = tpu.matmul %471, %269, %cst_114 {dimension_numbers = #tpu.dot_dimension_numbers<[1], [0], [0], [1], [0, 0, 1, 1], [], []>} : vector<8x32xf32>, vector<32x128xf32>, vector<8x128xf32> -> vector<8x128xf32>
    %475 = arith.addf %473, %474 : vector<8x128xf32>
    %476 = vector.extract_strided_slice %475 {offsets = [0, 0], sizes = [8, 32], strides = [1, 1]} : vector<8x128xf32> to vector<8x32xf32>
    %477 = arith.negf %476 : vector<8x32xf32>
    %478 = math.exp %477 : vector<8x32xf32>
    %cst_115 = arith.constant 1.000000e+00 : f32
    %479 = vector.broadcast %cst_115 : f32 to vector<8x32xf32>
    %480 = arith.addf %479, %478 : vector<8x32xf32>
    %481 = arith.divf %479, %480 : vector<8x32xf32>
    %482 = vector.extract_strided_slice %475 {offsets = [0, 32], sizes = [8, 32], strides = [1, 1]} : vector<8x128xf32> to vector<8x32xf32>
    %483 = arith.negf %482 : vector<8x32xf32>
    %484 = math.exp %483 : vector<8x32xf32>
    %cst_116 = arith.constant 1.000000e+00 : f32
    %485 = vector.broadcast %cst_116 : f32 to vector<8x32xf32>
    %486 = arith.addf %485, %484 : vector<8x32xf32>
    %487 = arith.divf %485, %486 : vector<8x32xf32>
    %488 = vector.extract_strided_slice %475 {offsets = [0, 64], sizes = [8, 32], strides = [1, 1]} : vector<8x128xf32> to vector<8x32xf32>
    %489 = math.tanh %488 : vector<8x32xf32>
    %490 = vector.extract_strided_slice %475 {offsets = [0, 96], sizes = [8, 32], strides = [1, 1]} : vector<8x128xf32> to vector<8x32xf32>
    %491 = arith.negf %490 : vector<8x32xf32>
    %492 = math.exp %491 : vector<8x32xf32>
    %cst_117 = arith.constant 1.000000e+00 : f32
    %493 = vector.broadcast %cst_117 : f32 to vector<8x32xf32>
    %494 = arith.addf %493, %492 : vector<8x32xf32>
    %495 = arith.divf %493, %494 : vector<8x32xf32>
    %496 = arith.mulf %487, %469 : vector<8x32xf32>
    %497 = arith.mulf %481, %489 : vector<8x32xf32>
    %498 = arith.addf %496, %497 : vector<8x32xf32>
    %499 = math.tanh %498 : vector<8x32xf32>
    %500 = arith.mulf %495, %499 : vector<8x32xf32>
    %c56 = arith.constant 56 : index
    %c0_118 = arith.constant 0 : index
    %501 = vector.load %arg22[%c56, %c0_118] : memref<64x32xf32, #tpu.memory_space<vmem>>, vector<8x32xf32>
    tpu.vector_store %arg22[%c56, %c0_118], %500 {strides = array<i32>} : memref<64x32xf32, #tpu.memory_space<vmem>>, vector<8x32xf32>,
    %c0_119 = arith.constant 0 : index
    %c0_120 = arith.constant 0 : index
    %502 = vector.load %arg22[%c0_119, %c0_120] : memref<64x32xf32, #tpu.memory_space<vmem>>, vector<64x32xf32>
    %c0_121 = arith.constant 0 : index
    %c0_122 = arith.constant 0 : index
    %503 = vector.load %arg17[%c0_121, %c0_122] : memref<32x128xf32, #tpu.memory_space<vmem>>, vector<32x128xf32>
    %cst_123 = arith.constant dense<0.000000e+00> : vector<64x128xf32>
    %504 = tpu.matmul %502, %503, %cst_123 {dimension_numbers = #tpu.dot_dimension_numbers<[1], [0], [0], [1], [0, 0, 1, 1], [], []>} : vector<64x32xf32>, vector<32x128xf32>, vector<64x128xf32> -> vector<64x128xf32>
    %c0_124 = arith.constant 0 : index
    %c0_125 = arith.constant 0 : index
    %505 = vector.load %arg18[%c0_124, %c0_125] : memref<1x128xf32, #tpu.memory_space<vmem>>, vector<1x128xf32>
    %506 = vector.broadcast %505 : vector<1x128xf32> to vector<64x128xf32>
    %507 = arith.addf %504, %506 : vector<64x128xf32>
    %c0_126 = arith.constant 0 : index
    %c0_127 = arith.constant 0 : index
    %508 = vector.load %arg19[%c0_126, %c0_127] : memref<64x128xf32, #tpu.memory_space<vmem>>, vector<64x128xf32>
    tpu.vector_store %arg19[%c0_126, %c0_127], %507 {strides = array<i32>} : memref<64x128xf32, #tpu.memory_space<vmem>>, vector<64x128xf32>,
    return
  }
}

</mosaic_0001>

<bundles_post_ra>
// kernel: music_vae_forward.1
= control target key start
LH: loop header
LB: loop body
LE: loop exit
PB: predicated region body
PF: predicated region fallthrough
CT: control target
= control target key end

     0   :  { %v3310_v0 = vmov 0.0|0.0   ;;  %vm3311_vm0 = vmmov 0   ;;  %v3312_v4 = vmov 0.0   ;;  %vm85_vm1 = vcmask 261120   ;;  %s3949_s4 = inlined_call_operand.vmem [shape: f32[32,128], index: 4, kind: input, shape index: {}]   ;;  %s3950_s3 = inlined_call_operand.vmem [shape: f32[32,128], index: 3, kind: input, shape index: {}]   ;;  %s3951_s0 = inlined_call_operand.vmem [shape: f32[64,32], index: 0, kind: input, shape index: {}]   ;;  %s3952_s1 = inlined_call_operand.vmem [shape: f32[8,32], index: 1, kind: input, shape index: {}]   ;;  %s3953_s6 = inlined_call_operand.vmem [shape: f32[32,128], index: 6, kind: input, shape index: {}]   ;;  %s3954_s5 = inlined_call_operand.vmem [shape: f32[1,128], index: 5, kind: input, shape index: {}]   ;;  %s3955_s7 = inlined_call_operand.vmem [shape: f32[32,16], index: 7, kind: input, shape index: {}]   ;;  %s3956_s9 = inlined_call_operand.vmem [shape: f32[32,16], index: 9, kind: input, shape index: {}]   ;;  %s3957_s12 = inlined_call_operand.vmem [shape: f32[32,32], index: 12, kind: input, shape index: {}]   ;;  %s3958_s11 = inlined_call_operand.vmem [shape: f32[16,32], index: 11, kind: input, shape index: {}]   ;;  %s3959_s14 = inlined_call_operand.vmem [shape: f32[32,128], index: 14, kind: input, shape index: {}]   ;;  %s3960_s16 = inlined_call_operand.vmem [shape: f32[32,128], index: 16, kind: input, shape index: {}]   ;;  %s3961_s8 = inlined_call_operand.vmem [shape: f32[1,16], index: 8, kind: input, shape index: {}]   ;;  %s3962_s10 = inlined_call_operand.vmem [shape: f32[1,16], index: 10, kind: input, shape index: {}]   ;;  %s3963_s20 = inlined_call_operand.vmem [shape: f32[8,16], index: 20, kind: output, shape index: {1}]   ;;  %s3964_s21 = inlined_call_operand.vmem [shape: f32[8,16], index: 21, kind: output, shape index: {2}]   ;;  %s3965_s2 = inlined_call_operand.vmem [shape: f32[8,16], index: 2, kind: input, shape index: {}]   ;;  %s3966_s13 = inlined_call_operand.vmem [shape: f32[1,32], index: 13, kind: input, shape index: {}]   ;;  %s3967_s15 = inlined_call_operand.vmem [shape: f32[1,128], index: 15, kind: input, shape index: {}]   ;;  %s3968_s17 = inlined_call_operand.vmem [shape: f32[32,128], index: 17, kind: input, shape index: {}]   ;;  %s3969_s18 = inlined_call_operand.vmem [shape: f32[1,128], index: 18, kind: input, shape index: {}]   ;;  %s3970_s19 = inlined_call_operand.vmem [shape: f32[64,128], index: 19, kind: output, shape index: {0}]  }
   0x1   :  { %3975 = sst [smem:[#allocation3_spill]] %s3949_s4  ;;  %3024 = vmatprep.subr.bf16.mxu0 %v3310_v0  ;;  %2745 = vmatprep.mubr.msk.f32.mxu0 %vm3311_vm0, %v3312_v4  ;;  %vm1261_vm2 = vcmask 130048  }
   0x2   :  { %3976 = sst [smem:[#allocation4_spill]] %s3950_s3  ;;  %s3981_s26 = sld [smem:[#allocation3_spill]] }
   0x3   :  { %3977 = sst [smem:[#allocation5_spill]] %s3951_s0  ;;  %s3982_s4 = sld [smem:[#allocation4_spill]] }
   0x4   :  { %3978 = sst [smem:[#allocation6_spill]] %s3952_s1  ;;  %s3983_s29 = sld [smem:[#allocation5_spill]] }
   0x5   :  { %3979 = sst [smem:[#allocation7_spill]] %s3953_s6  ;;  %s3984_s6 = sld [smem:[#allocation6_spill]] }
   0x6   :  { %3980 = sst [smem:[#allocation8_spill]] %s3954_s5  ;;  %s3985_s3 = sld [smem:[#allocation7_spill]] }
   0x7   :  { %s3986_s28 = sld [smem:[#allocation8_spill]] }
   0x8   :  { %v74_v1 = vld [vmem:[%s3981_s26] sm:$0xff]  ;;  %v75_v2 = vld [vmem:[%s3981_s26 + $0x8] sm:$0xff]  ;;  %v76_v7 = vld [vmem:[%s3981_s26 + $0x10] sm:$0xff] }
   0x9   :  { %v159_v3 = vld [vmem:[%s3982_s4] sm:$0xff]  ;;  %v3025_v5 = vpack.c.bf16 %v75_v2, %v74_v1  ;;  %v160_v6 = vld [vmem:[%s3982_s4 + $0x8] sm:$0xff]  ;;  %v77_v8 = vld [vmem:[%s3981_s26 + $0x18] sm:$0xff]  ;;  %s3313_s26 = smov 64  }
   0xa   :  { %v3030_v9 = vpack.c.bf16 %v160_v6, %v159_v3  ;;  %v161_v10 = vld [vmem:[%s3982_s4 + $0x10] sm:$0xff]  ;;  %v162_v11 = vld [vmem:[%s3982_s4 + $0x18] sm:$0xff]  ;;  %v3028_v12 = vpack.c.bf16 %v77_v8, %v76_v7  ;;  %v3455_v14 = vld [vmem:[%s3983_s29 + $0x20] sm:$0xff]  ;;  %s3314_s4 = smov 32  }
   0xb   :  { %3026 = vmatpush3.bf16.msra.mxu0 %v3025_v5  ;;  %v3034_v13 = vpack.c.bf16 %v162_v11, %v161_v10  ;;  %2762 = vmatprep.mubr.msk.f32.mxu1 %vm85_vm1, %v3455_v14  ;;  %v3463_v15 = vld [vmem:[%s3984_s6] sm:$0xff]  ;;  %v3479_v19 = vld [vmem:[%s3983_s29 + $0x28] sm:$0xff]  ;;  %v3486_v20 = vld [vmem:[%s3983_s29 + $0x30] sm:$0xff] }
   0xc   :  { %3171 = vmatprep.subr.bf16.mxu1 %v3030_v9  ;;  %3027 = vmatprep.subr.bf16.mxu0 %v3310_v0  ;;  %v3468_v16 = vld [vmem:[%s3983_s29] sm:$0xff]  ;;  %v293_v18 = vld [vmem:[%s3985_s3 + $0x8] sm:$0xff]  ;;  %v294_v22 = vld [vmem:[%s3985_s3 + $0x10] sm:$0xff] }
   0xd   :  { %3173 = vmatpush3.bf16.msra.mxu1 %v3030_v9  ;;  %v292_v17 = vld [vmem:[%s3985_s3] sm:$0xff]  ;;  %v295_v23 = vld [vmem:[%s3985_s3 + $0x18] sm:$0xff]  ;;  %v3513_v25 = vld [vmem:[%s3983_s29 + $0x8] sm:$0xff] }
   0xe   :  { %3172 = vmatprep.subr.bf16.mxu1 %v3034_v13  ;;  %v3491_v21 = vpack.c.bf16 %v293_v18, %v292_v17  ;;  %v3506_v24 = vld [vmem:[%s3983_s29 + $0x38] sm:$0xff]  ;;  %v3515_v26 = vpack.c.bf16 %v295_v23, %v294_v22  ;;  %v3523_v27 = vld [vmem:[%s3983_s29 + $0x10] sm:$0xff]  ;;  %v2532_v29 = vld [vmem:[%s3986_s28] ss:$0 sm:$0xff] }
   0xf   :  { %3029 = vmatpush3.bf16.msra.mxu0 %v3028_v12  ;;  %v3537_v28 = vld [vmem:[%s3983_s29 + $0x18] sm:$0xff] }
  0x10   :  { %3031 = vmatprep.subr.bf16.mxu0 %v3030_v9 }
  0x11   :  { %3174 = vmatpush3.bf16.msra.mxu1 %v3034_v13 }
  0x12   :  { %2746 = vmatmul.mubr.msk.f32.vlgmr.msra.gmra.mrb[0].mxu0 %vm85_vm1, %v3463_v15  ;;  %3050 = vmatprep.subr.bf16.mxu1 %v3310_v0 }
  0x13   :  { %3033 = vmatpush3.bf16.msra.mxu0 %v3030_v9  ;;  %2756 = vmatprep.mubr.msk.f32.mxu0 %vm85_vm1, %v3468_v16 }
  0x14   :  { %2763 = vmatmul.mubr.msk.f32.vlgmr.msra.gmra.mrb[0].mxu1 %vm85_vm1, %v3479_v19  ;;  %3035 = vmatprep.subr.bf16.mxu0 %v3034_v13 }
  0x15   :  { %2765 = vmatprep.mubr.msk.f32.mxu1 %vm85_vm1, %v3486_v20  ;;  %3052 = vmatpush3.bf16.msra.mxu1 %v3491_v21 }
  0x16   :  { %3053 = vmatprep.subr.bf16.mxu1 %v3310_v0 }
  0x17   :  { %3037 = vmatpush3.bf16.msra.mxu0 %v3034_v13 }
  0x18   :  { %2766 = vmatmul.mubr.msk.f32.gmra.mrb[2].mxu1 %vm85_vm1, %v3506_v24  ;;  %3038 = vmatprep.subr.bf16.mxu0 %v3310_v0 }
  0x19   :  { %3055 = vmatpush3.bf16.msra.mxu1 %v3515_v26  ;;  %2798 = vmatprep.mubr.msk.f32.mxu1 %vm3311_vm0, %v3312_v4 }
  0x1a   :  { %2757 = vmatmul.mubr.msk.f32.vlgmr.msra.gmra.mrb[2].mxu0 %vm85_vm1, %v3513_v25  ;;  %3062 = vmatprep.subr.bf16.mxu1 %v3310_v0 }
  0x1b   :  { %3040 = vmatpush3.bf16.msra.mxu0 %v3491_v21  ;;  %2759 = vmatprep.mubr.msk.f32.mxu0 %vm85_vm1, %v3523_v27 }
  0x1c   :  { %3041 = vmatprep.subr.bf16.mxu0 %v3310_v0 }
  0x1e   :  { %2760 = vmatmul.mubr.msk.f32.gmra.mrb[4].mxu0 %vm85_vm1, %v3537_v28 }
  0x1f   :  { %3043 = vmatpush3.bf16.msra.mxu0 %v3515_v26  ;;  %2776 = vmatprep.mubr.msk.f32.mxu0 %vm3311_vm0, %v3312_v4 }
  0x20   :  { %3044 = vmatprep.subr.bf16.mxu0 %v3310_v0 }
  0x22   :  { %2777 = vmatmul.mubr.f32.vlgmr.msra.gmra.mrb[6].mxu0 %v3312_v4 }
  0x23   :  { %3046 = vmatpush3.bf16.msra.mxu0 %v3491_v21  ;;  %2787 = vmatprep.mubr.msk.f32.mxu0 %vm3311_vm0, %v3312_v4 }
  0x24   :  { %3047 = vmatprep.subr.bf16.mxu0 %v3310_v0 }
  0x27   :  { %3049 = vmatpush3.bf16.msra.mxu0 %v3515_v26 }
  0x28   :  { %3056 = vmatprep.subr.bf16.mxu0 %v3310_v0 }
  0xe5   :  { %v155_v30 = vpop.f32.mrb[0].mxu0 }
  0xe6   :  { %v156_v31 = vadd.f32 %v2532_v29, %v155_v30  ;;  %v2747_v32 = vpop.f32.mrb[1].mxu0 }
  0xe7   :  { %v2764_v33 = vpop.f32.mrb[0].mxu1 }
  0xe8   :  { %v3556_v34 = vadd.f32 %v2764_v33, %v156_v31  ;;  %v273_v35 = vpop.f32.mrb[1].mxu1 }
  0xe9   :  { %v3558_v36 = vadd.f32 %v273_v35, %v156_v31 }
  0xeb   :  { %v2767_v37 = vpop.f32.mrb[2].mxu1 }
  0xec   :  { %v3560_v38 = vadd.f32 %v2767_v37, %v156_v31  ;;  %v283_v39 = vpop.f32.mrb[3].mxu1 }
  0xed   :  { %v3562_v40 = vadd.f32 %v283_v39, %v156_v31  ;;  %v2758_v41 = vpop.f32.mrb[2].mxu0 }
  0xee   :  { %v259_v42 = vadd.f32 %v2758_v41, %v156_v31  ;;  %v253_v43 = vpop.f32.mrb[3].mxu0 }
  0xef   :  { %v254_v44 = vadd.f32 %v253_v43, %v156_v31 }
  0xf1   :  { %v2761_v45 = vpop.f32.mrb[4].mxu0 }
  0xf2   :  { %v3564_v46 = vadd.f32 %v2761_v45, %v156_v31  ;;  %v263_v47 = vpop.f32.mrb[5].mxu0 }
  0xf3   :  { %v3566_v48 = vadd.f32 %v263_v47, %v156_v31 }
  0xf5   :  { %v365_v49 = vpop.f32.mrb[6].mxu0 }
  0xf6   :  { %v369_v50 = vadd.f32 %v365_v49, %v254_v44  ;;  %v2778_v51 = vpop.f32.mrb[7].mxu0 }
  0xf8   :  { %3180 = vtanh.f32 %v369_v50  ;;  %v2542_v53 = vmul.f32 -1.442695, %v369_v50 }
  0xfa   :  { %3182 = vpow2.f32 %v2542_v53 }
 0x102   :  { %v3181_v52 = vpop.eup %3180 }
 0x103   :  { %379 = vrot.lane.b32.xlu0 %v3181_v52, %s3313_s26 }
 0x104   :  { %v3183_v54 = vpop.eup %3182 }
 0x105   :  { %v373_v55 = vadd.f32 1.0, %v3183_v54 }
 0x107   :  { %3184 = vrcp.f32 %v373_v55 }
 0x111   :  { %v3185_v56 = vpop.eup %3184 }
 0x112   :  { %v377_v59 = vmul.f32 0.0, %v3185_v56 }
 0x175   :  { %v380_v57 = vpop.permute.xlu0 %379 }
 0x176   :  { %v382_v58 = vmul.f32 %v3185_v56, %v380_v57 }
 0x178   :  { %384 = vrot.lane.b32.xlu0 %v382_v58, %s3314_s4 }
 0x1ea   :  { %v385_v60 = vpop.permute.xlu0 %384 }
 0x1eb   :  { %v387_v61 = vadd.f32 %v385_v60, %v377_v59 }
 0x1ed   :  { %3186 = vtanh.f32 %v387_v61 }
 0x1f7   :  { %v3187_v62 = vpop.eup %3186 }
 0x1f8   :  { %390 = vrot.lane.b32.xlu1 %v3187_v62, %s3313_s26 }
 0x26a   :  { %v391_v63 = vpop.permute.xlu1 %390 }
 0x26b   :  { %v393_v1 = vmul.f32 %v3185_v56, %v391_v63 }
 0x26d   :  { %395 = vrot.lane.b32.xlu1 %v393_v1, %s3314_s4 }
 0x2df   :  { %v396_v2 = vpop.permute.xlu1 %395 }
 0x2e0   :  { %2788 = vmatmul.mubr.msk.f32.vlgmr.msra.gmra.mrb[8].mxu0 %vm85_vm1, %v396_v2 }
 0x2e1   :  { %3058 = vmatpush3.bf16.msra.mxu0 %v3491_v21  ;;  %2809 = vmatprep.mubr.msk.f32.mxu0 %vm3311_vm0, %v3312_v4 }
 0x2e2   :  { %3059 = vmatprep.subr.bf16.mxu0 %v3310_v0 }
 0x2e5   :  { %3061 = vmatpush3.bf16.msra.mxu0 %v3515_v26 }
 0x2e6   :  { %3068 = vmatprep.subr.bf16.mxu0 %v3310_v0 }
 0x3b3   :  { %v465_v3 = vpop.f32.mrb[8].mxu0 }
 0x3b4   :  { %v469_v5 = vadd.f32 %v465_v3, %v259_v42  ;;  %v2789_v6 = vpop.f32.mrb[9].mxu0 }
 0x3b6   :  { %3188 = vtanh.f32 %v469_v5  ;;  %v2544_v8 = vmul.f32 -1.442695, %v469_v5 }
 0x3b8   :  { %3190 = vpow2.f32 %v2544_v8 }
 0x3c0   :  { %v3189_v7 = vpop.eup %3188 }
 0x3c1   :  { %479 = vrot.lane.b32.xlu0 %v3189_v7, %s3313_s26 }
 0x3c2   :  { %v3191_v9 = vpop.eup %3190 }
 0x3c3   :  { %v473_v10 = vadd.f32 1.0, %v3191_v9 }
 0x3c5   :  { %3192 = vrcp.f32 %v473_v10 }
 0x3cf   :  { %v3193_v11 = vpop.eup %3192 }
 0x3d0   :  { %v477_v17 = vmul.f32 %v3193_v11, %v387_v61 }
 0x433   :  { %v480_v12 = vpop.permute.xlu0 %479 }
 0x434   :  { %v482_v13 = vmul.f32 %v3193_v11, %v480_v12 }
 0x436   :  { %484 = vrot.lane.b32.xlu1 %v482_v13, %s3314_s4 }
 0x4a8   :  { %v485_v18 = vpop.permute.xlu1 %484 }
 0x4a9   :  { %v487_v22 = vadd.f32 %v485_v18, %v477_v17 }
 0x4ab   :  { %3194 = vtanh.f32 %v487_v22 }
 0x4b5   :  { %v3195_v23 = vpop.eup %3194 }
 0x4b6   :  { %490 = vrot.lane.b32.xlu0 %v3195_v23, %s3313_s26 }
 0x528   :  { %v491_v29 = vpop.permute.xlu0 %490 }
 0x529   :  { %v493_v30 = vmul.f32 %v3193_v11, %v491_v29 }
 0x52b   :  { %495 = vrot.lane.b32.xlu1 %v493_v30, %s3314_s4 }
 0x59d   :  { %v496_v31 = vpop.permute.xlu1 %495 }
 0x59e   :  { %2799 = vmatmul.mubr.msk.f32.vlgmr.msra.gmra.mrb[4].mxu1 %vm85_vm1, %v496_v31 }
 0x59f   :  { %3064 = vmatpush3.bf16.msra.mxu1 %v3491_v21  ;;  %2820 = vmatprep.mubr.msk.f32.mxu1 %vm3311_vm0, %v3312_v4 }
 0x5a0   :  { %3065 = vmatprep.subr.bf16.mxu1 %v3310_v0 }
 0x5a3   :  { %3067 = vmatpush3.bf16.msra.mxu1 %v3515_v26 }
 0x5a4   :  { %3074 = vmatprep.subr.bf16.mxu1 %v3310_v0 }
 0x671   :  { %v565_v32 = vpop.f32.mrb[4].mxu1 }
 0x672   :  { %v569_v33 = vadd.f32 %v565_v32, %v3566_v48  ;;  %v2800_v35 = vpop.f32.mrb[5].mxu1 }
 0x674   :  { %3196 = vtanh.f32 %v569_v33  ;;  %v2546_v39 = vmul.f32 -1.442695, %v569_v33 }
 0x676   :  { %3198 = vpow2.f32 %v2546_v39 }
 0x67e   :  { %v3197_v37 = vpop.eup %3196 }
 0x67f   :  { %579 = vrot.lane.b32.xlu0 %v3197_v37, %s3313_s26 }
 0x680   :  { %v3199_v41 = vpop.eup %3198 }
 0x681   :  { %v573_v42 = vadd.f32 1.0, %v3199_v41 }
 0x683   :  { %3200 = vrcp.f32 %v573_v42 }
 0x68d   :  { %v3201_v43 = vpop.eup %3200 }
 0x68e   :  { %v577_v47 = vmul.f32 %v3201_v43, %v487_v22 }
 0x6f1   :  { %v580_v44 = vpop.permute.xlu0 %579 }
 0x6f2   :  { %v582_v45 = vmul.f32 %v3201_v43, %v580_v44 }
 0x6f4   :  { %584 = vrot.lane.b32.xlu1 %v582_v45, %s3314_s4 }
 0x766   :  { %v585_v49 = vpop.permute.xlu1 %584 }
 0x767   :  { %v587_v50 = vadd.f32 %v585_v49, %v577_v47 }
 0x769   :  { %3202 = vtanh.f32 %v587_v50 }
 0x773   :  { %v3203_v48 = vpop.eup %3202 }
 0x774   :  { %590 = vrot.lane.b32.xlu0 %v3203_v48, %s3313_s26 }
 0x7e6   :  { %v591_v51 = vpop.permute.xlu0 %590 }
 0x7e7   :  { %v593_v52 = vmul.f32 %v3201_v43, %v591_v51 }
 0x7e9   :  { %595 = vrot.lane.b32.xlu1 %v593_v52, %s3314_s4 }
 0x85b   :  { %v596_v53 = vpop.permute.xlu1 %595 }
 0x85c   :  { %2810 = vmatmul.mubr.msk.f32.vlgmr.msra.gmra.mrb[10].mxu0 %vm85_vm1, %v596_v53 }
 0x85d   :  { %3070 = vmatpush3.bf16.msra.mxu0 %v3491_v21  ;;  %2831 = vmatprep.mubr.msk.f32.mxu0 %vm3311_vm0, %v3312_v4 }
 0x85e   :  { %3071 = vmatprep.subr.bf16.mxu0 %v3310_v0 }
 0x861   :  { %3073 = vmatpush3.bf16.msra.mxu0 %v3515_v26 }
 0x862   :  { %3080 = vmatprep.subr.bf16.mxu0 %v3310_v0 }
 0x92f   :  { %v665_v54 = vpop.f32.mrb[10].mxu0 }
 0x930   :  { %v669_v55 = vadd.f32 %v665_v54, %v3564_v46  ;;  %v2811_v56 = vpop.f32.mrb[11].mxu0 }
 0x932   :  { %3204 = vtanh.f32 %v669_v55  ;;  %v2548_v58 = vmul.f32 -1.442695, %v669_v55 }
 0x934   :  { %3206 = vpow2.f32 %v2548_v58 }
 0x93c   :  { %v3205_v57 = vpop.eup %3204 }
 0x93d   :  { %679 = vrot.lane.b32.xlu0 %v3205_v57, %s3313_s26 }
 0x93e   :  { %v3207_v59 = vpop.eup %3206 }
 0x93f   :  { %v673_v60 = vadd.f32 1.0, %v3207_v59 }
 0x941   :  { %3208 = vrcp.f32 %v673_v60 }
 0x94b   :  { %v3209_v61 = vpop.eup %3208 }
 0x94c   :  { %v677_v1 = vmul.f32 %v3209_v61, %v587_v50 }
 0x9af   :  { %v680_v62 = vpop.permute.xlu0 %679 }
 0x9b0   :  { %v682_v63 = vmul.f32 %v3209_v61, %v680_v62 }
 0x9b2   :  { %684 = vrot.lane.b32.xlu1 %v682_v63, %s3314_s4 }
 0xa24   :  { %v685_v2 = vpop.permute.xlu1 %684 }
 0xa25   :  { %v687_v3 = vadd.f32 %v685_v2, %v677_v1 }
 0xa27   :  { %3210 = vtanh.f32 %v687_v3 }
 0xa31   :  { %v3211_v46 = vpop.eup %3210 }
 0xa32   :  { %690 = vrot.lane.b32.xlu0 %v3211_v46, %s3313_s26 }
 0xaa4   :  { %v691_v5 = vpop.permute.xlu0 %690 }
 0xaa5   :  { %v693_v6 = vmul.f32 %v3209_v61, %v691_v5 }
 0xaa7   :  { %695 = vrot.lane.b32.xlu1 %v693_v6, %s3314_s4 }
 0xb19   :  { %v696_v7 = vpop.permute.xlu1 %695 }
 0xb1a   :  { %2821 = vmatmul.mubr.msk.f32.vlgmr.msra.gmra.mrb[6].mxu1 %vm85_vm1, %v696_v7 }
 0xb1b   :  { %3076 = vmatpush3.bf16.msra.mxu1 %v3491_v21  ;;  %2842 = vmatprep.mubr.msk.f32.mxu1 %vm3311_vm0, %v3312_v4 }
 0xb1c   :  { %3077 = vmatprep.subr.bf16.mxu1 %v3310_v0 }
 0xb1f   :  { %3079 = vmatpush3.bf16.msra.mxu1 %v3515_v26 }
 0xb20   :  { %3086 = vmatprep.subr.bf16.mxu1 %v3310_v0 }
 0xbed   :  { %v765_v8 = vpop.f32.mrb[6].mxu1 }
 0xbee   :  { %v769_v9 = vadd.f32 %v765_v8, %v3558_v36  ;;  %v2822_v10 = vpop.f32.mrb[7].mxu1 }
 0xbf0   :  { %3212 = vtanh.f32 %v769_v9  ;;  %v2550_v12 = vmul.f32 -1.442695, %v769_v9 }
 0xbf2   :  { %3214 = vpow2.f32 %v2550_v12 }
 0xbfa   :  { %v3213_v11 = vpop.eup %3212 }
 0xbfb   :  { %779 = vrot.lane.b32.xlu0 %v3213_v11, %s3313_s26 }
 0xbfc   :  { %v3215_v13 = vpop.eup %3214 }
 0xbfd   :  { %v773_v17 = vadd.f32 1.0, %v3215_v13 }
 0xbff   :  { %3216 = vrcp.f32 %v773_v17 }
 0xc09   :  { %v3217_v18 = vpop.eup %3216 }
 0xc0a   :  { %v777_v29 = vmul.f32 %v3217_v18, %v687_v3 }
 0xc6d   :  { %v780_v22 = vpop.permute.xlu0 %779 }
 0xc6e   :  { %v782_v23 = vmul.f32 %v3217_v18, %v780_v22 }
 0xc70   :  { %784 = vrot.lane.b32.xlu1 %v782_v23, %s3314_s4 }
 0xce2   :  { %v785_v30 = vpop.permute.xlu1 %784 }
 0xce3   :  { %v787_v31 = vadd.f32 %v785_v30, %v777_v29 }
 0xce5   :  { %3218 = vtanh.f32 %v787_v31 }
 0xcef   :  { %v3219_v36 = vpop.eup %3218 }
 0xcf0   :  { %790 = vrot.lane.b32.xlu0 %v3219_v36, %s3313_s26  ;;  %v1180_v36 = vld [vmem:[%s3956_s9] sm:$0xff] }
 0xd62   :  { %v791_v32 = vpop.permute.xlu0 %790 }
 0xd63   :  { %v793_v33 = vmul.f32 %v3217_v18, %v791_v32 }
 0xd65   :  { %795 = vrot.lane.b32.xlu1 %v793_v33, %s3314_s4  ;;  %v1181_v33 = vld [vmem:[%s3956_s9 + $0x8] sm:$0xff] }
 0xdd7   :  { %v796_v35 = vpop.permute.xlu1 %795 }
 0xdd8   :  { %2832 = vmatmul.mubr.msk.f32.vlgmr.msra.gmra.mrb[12].mxu0 %vm85_vm1, %v796_v35  ;;  %v1096_v35 = vld [vmem:[%s3955_s7 + $0x10] sm:$0xff] }
 0xdd9   :  { %3082 = vmatpush3.bf16.msra.mxu0 %v3491_v21  ;;  %2853 = vmatprep.mubr.msk.f32.mxu0 %vm3311_vm0, %v3312_v4 }
 0xdda   :  { %3083 = vmatprep.subr.bf16.mxu0 %v3310_v0 }
 0xddd   :  { %3085 = vmatpush3.bf16.msra.mxu0 %v3515_v26 }
 0xdde   :  { %3092 = vmatprep.subr.bf16.mxu0 %v3310_v0 }
 0xeab   :  { %v865_v37 = vpop.f32.mrb[12].mxu0 }
 0xeac   :  { %v869_v39 = vadd.f32 %v865_v37, %v3556_v34  ;;  %v2833_v41 = vpop.f32.mrb[13].mxu0  ;;  %v1097_v37 = vld [vmem:[%s3955_s7 + $0x18] sm:$0xff] }
 0xead   :  { %v1182_v41 = vld [vmem:[%s3956_s9 + $0x10] sm:$0xff] }
 0xeae   :  { %3220 = vtanh.f32 %v869_v39  ;;  %v2552_v43 = vmul.f32 -1.442695, %v869_v39  ;;  %v3093_v39 = vpack.c.bf16 %v1181_v33, %v1180_v36 }
 0xeb0   :  { %3222 = vpow2.f32 %v2552_v43  ;;  %v3090_v43 = vpack.c.bf16 %v1097_v37, %v1096_v35 }
 0xeb8   :  { %v3221_v42 = vpop.eup %3220 }
 0xeb9   :  { %879 = vrot.lane.b32.xlu0 %v3221_v42, %s3313_s26  ;;  %v1183_v42 = vld [vmem:[%s3956_s9 + $0x18] sm:$0xff] }
 0xeba   :  { %v3223_v21 = vpop.eup %3222 }
 0xebb   :  { %v873_v44 = vadd.f32 1.0, %v3223_v21  ;;  %v3096_v21 = vpack.c.bf16 %v1183_v42, %v1182_v41 }
 0xebd   :  { %3224 = vrcp.f32 %v873_v44 }
 0xec7   :  { %v3225_v45 = vpop.eup %3224 }
 0xec8   :  { %v877_v26 = vmul.f32 %v3225_v45, %v787_v31  ;;  %v1095_v31 = vld [vmem:[%s3955_s7 + $0x8] sm:$0xff] }
 0xf2b   :  { %v880_v47 = vpop.permute.xlu0 %879 }
 0xf2c   :  { %v882_v49 = vmul.f32 %v3225_v45, %v880_v47 }
 0xf2e   :  { %884 = vrot.lane.b32.xlu1 %v882_v49, %s3314_s4 }
 0xfa0   :  { %v885_v50 = vpop.permute.xlu1 %884 }
 0xfa1   :  { %v887_v48 = vadd.f32 %v885_v50, %v877_v26  ;;  %v1272_v26 = vld [vmem:[%s3957_s12] sm:$0xff]  ;;  %v1273_v50 = vld [vmem:[%s3957_s12 + $0x8] sm:$0xff] }
 0xfa3   :  { %3226 = vtanh.f32 %v887_v48 }
 0xfad   :  { %v3227_v34 = vpop.eup %3226 }
 0xfae   :  { %890 = vrot.lane.b32.xlu0 %v3227_v34, %s3313_s26  ;;  %v3099_v34 = vpack.c.bf16 %v1273_v50, %v1272_v26 }
0x1020   :  { %v891_v51 = vpop.permute.xlu0 %890 }
0x1021   :  { %v893_v52 = vmul.f32 %v3225_v45, %v891_v51  ;;  %v1275_v51 = vld [vmem:[%s3957_s12 + $0x18] sm:$0xff] }
0x1023   :  { %895 = vrot.lane.b32.xlu1 %v893_v52, %s3314_s4  ;;  %v1270_v52 = vld [vmem:[%s3958_s11] sm:$0xff] }
0x1095   :  { %v896_v53 = vpop.permute.xlu1 %895 }
0x1096   :  { %2843 = vmatmul.mubr.msk.f32.vlgmr.msra.gmra.mrb[8].mxu1 %vm85_vm1, %v896_v53  ;;  %v1271_v53 = vld [vmem:[%s3958_s11 + $0x8] sm:$0xff] }
0x1097   :  { %2864 = vmatprep.mubr.msk.f32.mxu1 %vm3311_vm0, %v3312_v4 }
0x1169   :  { %v965_v54 = vpop.f32.mrb[8].mxu1 }
0x116a   :  { %v969_v55 = vadd.f32 %v965_v54, %v3562_v40  ;;  %v2844_v56 = vpop.f32.mrb[9].mxu1  ;;  %v3105_v54 = vpack.c.bf16 %v1271_v53, %v1270_v52 }
0x116b   :  { %v1427_v56 = vld [vmem:[%s3959_s14] sm:$0xff] }
0x116c   :  { %3228 = vtanh.f32 %v969_v55  ;;  %v2554_v58 = vmul.f32 -1.442695, %v969_v55 }
0x116e   :  { %3230 = vpow2.f32 %v2554_v58  ;;  %v1429_v58 = vld [vmem:[%s3959_s14 + $0x10] sm:$0xff] }
0x1176   :  { %v3229_v57 = vpop.eup %3228 }
0x1177   :  { %979 = vrot.lane.b32.xlu0 %v3229_v57, %s3313_s26  ;;  %v1428_v57 = vld [vmem:[%s3959_s14 + $0x8] sm:$0xff] }
0x1178   :  { %v3231_v59 = vpop.eup %3230 }
0x1179   :  { %v973_v60 = vadd.f32 1.0, %v3231_v59  ;;  %v3107_v59 = vpack.c.bf16 %v1428_v57, %v1427_v56 }
0x117b   :  { %3232 = vrcp.f32 %v973_v60 }
0x1185   :  { %v3233_v61 = vpop.eup %3232 }
0x1186   :  { %v977_v1 = vmul.f32 %v3233_v61, %v887_v48  ;;  %v1274_v48 = vld [vmem:[%s3957_s12 + $0x10] sm:$0xff] }
0x1187   :  { %v3102_v55 = vpack.c.bf16 %v1275_v51, %v1274_v48 }
0x11e9   :  { %v980_v62 = vpop.permute.xlu0 %979 }
0x11ea   :  { %v982_v63 = vmul.f32 %v3233_v61, %v980_v62 }
0x11ec   :  { %984 = vrot.lane.b32.xlu1 %v982_v63, %s3314_s4 }
0x125e   :  { %v985_v2 = vpop.permute.xlu1 %984 }
0x125f   :  { %v987_v3 = vadd.f32 %v985_v2, %v977_v1 }
0x1261   :  { %3234 = vtanh.f32 %v987_v3 }
0x126b   :  { %v3235_v40 = vpop.eup %3234 }
0x126c   :  { %990 = vrot.lane.b32.xlu0 %v3235_v40, %s3313_s26 }
0x12de   :  { %v991_v46 = vpop.permute.xlu0 %990 }
0x12df   :  { %v993_v5 = vmul.f32 %v3233_v61, %v991_v46  ;;  %v1544_v61 = vld [vmem:[%s3960_s16 + $0x8] sm:$0xff] }
0x12e1   :  { %995 = vrot.lane.b32.xlu1 %v993_v5, %s3314_s4 }
0x1353   :  { %v996_v6 = vpop.permute.xlu1 %995 }
0x1354   :  { %2854 = vmatmul.mubr.msk.f32.vlgmr.msra.gmra.mrb[14].mxu0 %vm85_vm1, %v996_v6 }
0x1355   :  { %2875 = vmatprep.mubr.msk.f32.mxu0 %vm3311_vm0, %v3312_v4  ;;  %3094 = vmatpush3.bf16.msra.mxu0 %v3093_v39 }
0x1356   :  { %3095 = vmatprep.subr.bf16.mxu0 %v3310_v0 }
0x1359   :  { %3097 = vmatpush3.bf16.msra.mxu0 %v3096_v21 }
0x135a   :  { %3104 = vmatprep.subr.bf16.mxu0 %v3310_v0 }
0x1427   :  { %v1065_v7 = vpop.f32.mrb[14].mxu0 }
0x1428   :  { %v1069_v8 = vadd.f32 %v1065_v7, %v3560_v38  ;;  %v2855_v9 = vpop.f32.mrb[15].mxu0  ;;  %v1094_v38 = vld [vmem:[%s3955_s7] sm:$0xff] }
0x1429   :  { %v3087_v32 = vpack.c.bf16 %v1095_v31, %v1094_v38  ;;  %v1546_v9 = vld [vmem:[%s3960_s16 + $0x18] sm:$0xff] }
0x142a   :  { %3236 = vtanh.f32 %v1069_v8  ;;  %v2556_v11 = vmul.f32 -1.442695, %v1069_v8  ;;  %v1545_v8 = vld [vmem:[%s3960_s16 + $0x10] sm:$0xff] }
0x142b   :  { %3088 = vmatpush3.bf16.msra.mxu1 %v3087_v32 }
0x142c   :  { %3238 = vpow2.f32 %v2556_v11  ;;  %3089 = vmatprep.subr.bf16.mxu1 %v3310_v0 }
0x142f   :  { %3091 = vmatpush3.bf16.msra.mxu1 %v3090_v43 }
0x1430   :  { %3098 = vmatprep.subr.bf16.mxu1 %v3310_v0 }
0x1434   :  { %v3237_v10 = vpop.eup %3236 }
0x1435   :  { %1079 = vrot.lane.b32.xlu0 %v3237_v10, %s3313_s26  ;;  %v3772_v10 = vpack.c.bf16 %v1546_v9, %v1545_v8 }
0x1436   :  { %v3239_v12 = vpop.eup %3238 }
0x1437   :  { %v1073_v13 = vadd.f32 1.0, %v3239_v12 }
0x1439   :  { %3240 = vrcp.f32 %v1073_v13 }
0x1443   :  { %v3241_v17 = vpop.eup %3240 }
0x1444   :  { %v1077_v23 = vmul.f32 %v3241_v17, %v987_v3  ;;  %v1264_v3 = vld [vmem:[%s3965_s2] sm:$0xff] }
0x14a7   :  { %v1080_v18 = vpop.permute.xlu0 %1079 }
0x14a8   :  { %v1082_v22 = vmul.f32 %v3241_v17, %v1080_v18 }
0x14aa   :  { %1084 = vrot.lane.b32.xlu1 %v1082_v22, %s3314_s4 }
0x151c   :  { %v1085_v29 = vpop.permute.xlu1 %1084 }
0x151d   :  { %v1087_v30 = vadd.f32 %v1085_v29, %v1077_v23  ;;  %v3791_v29 = vld [vmem:[%s3967_s15] ss:$0 sm:$0xff] }
0x151f   :  { %3242 = vtanh.f32 %v1087_v30 }
0x1529   :  { %v3243_v44 = vpop.eup %3242 }
0x152a   :  { %1090 = vrot.lane.b32.xlu0 %v3243_v44, %s3313_s26 }
0x159c   :  { %v1091_v45 = vpop.permute.xlu0 %1090 }
0x159d   :  { %v1093_v47 = vmul.f32 %v3241_v17, %v1091_v45  ;;  %v2563_v17 = vld [vmem:[%s3966_s13] ss:$0 sm:$0xff] }
0x159f   :  { %1106 = vrot.lane.b32.xlu1 %v1093_v47, %s3314_s4 }
0x1611   :  { %v1107_v49 = vpop.permute.xlu1 %1106 }
0x1612   :  { %2865 = vmatmul.mubr.msk.f32.vlgmr.msra.gmra.mrb[10].mxu1 %vm85_vm1, %v1107_v49  ;;  %2876 = vmatmul.mubr.msk.f32.vlgmr.msra.gmra.mrb[16].mxu0 %vm85_vm1, %v1107_v49 }
0x1613   :  { %2886 = vmatprep.mubr.msk.f32.mxu1 %vm3311_vm0, %v3312_v4  ;;  %2893 = vmatprep.mubr.msk.f32.mxu0 %vm3311_vm0, %v3312_v4 }
0x1614   :  { %3100 = vmatpush3.bf16.msra.mxu1 %v3099_v34  ;;  %3106 = vmatpush3.bf16.msra.mxu0 %v3105_v54 }
0x1615   :  { %3101 = vmatprep.subr.bf16.mxu1 %v3310_v0  ;;  %3115 = vmatprep.subr.bf16.mxu0 %v3310_v0 }
0x1618   :  { %3103 = vmatpush3.bf16.msra.mxu1 %v3102_v55 }
0x1619   :  { %3108 = vmatprep.subr.bf16.mxu1 %v3107_v59 }
0x161b   :  { %2887 = vmatmul.mubr.msk.f32.vlgmr.msra.gmra.mrb[12].mxu1 %vm85_vm1, %v3463_v15  ;;  %v1430_v15 = vld [vmem:[%s3959_s14 + $0x18] sm:$0xff] }
0x161c   :  { %2904 = vmatprep.mubr.msk.f32.mxu1 %vm85_vm1, %v3468_v16  ;;  %v3111_v60 = vpack.c.bf16 %v1430_v15, %v1429_v58  ;;  %3110 = vmatpush3.bf16.msra.mxu1 %v3107_v59  ;;  %v1543_v16 = vld [vmem:[%s3960_s16] sm:$0xff] }
0x161d   :  { %v3724_v62 = vpack.c.bf16 %v1544_v61, %v1543_v16 }
0x161e   :  { %3112 = vmatprep.subr.bf16.mxu1 %v3111_v60 }
0x1620   :  { %3114 = vmatpush3.bf16.msra.mxu1 %v3111_v60 }
0x1621   :  { %3127 = vmatprep.subr.bf16.mxu1 %v3310_v0 }
0x1623   :  { %2905 = vmatmul.mubr.msk.f32.vlgmr.msra.gmra.mrb[14].mxu1 %vm85_vm1, %v3513_v25  ;;  %v2557_v25 = vld [vmem:[%s3961_s8] ss:$0 sm:$0xff] }
0x1624   :  { %3129 = vmatpush3.bf16.msra.mxu1 %v3724_v62  ;;  %2907 = vmatprep.mubr.msk.f32.mxu1 %vm85_vm1, %v3523_v27 }
0x1625   :  { %3130 = vmatprep.subr.bf16.mxu1 %v3310_v0 }
0x1627   :  { %2908 = vmatmul.mubr.msk.f32.gmra.mrb[16].mxu1 %vm85_vm1, %v3537_v28 }
0x1628   :  { %2910 = vmatprep.mubr.msk.f32.mxu1 %vm85_vm1, %v3455_v14  ;;  %v2559_v14 = vld [vmem:[%s3962_s10] ss:$0 sm:$0xff]  ;;  %3132 = vmatpush3.bf16.msra.mxu1 %v3772_v10 }
0x1629   :  { %3139 = vmatprep.subr.bf16.mxu1 %v3310_v0 }
0x162b   :  { %2911 = vmatmul.mubr.msk.f32.gmra.mrb[18].mxu1 %vm85_vm1, %v3479_v19 }
0x162c   :  { %2913 = vmatprep.mubr.msk.f32.mxu1 %vm85_vm1, %v3486_v20 }
0x162f   :  { %2914 = vmatmul.mubr.msk.f32.gmra.mrb[20].mxu1 %vm85_vm1, %v3506_v24 }
0x1630   :  { %2946 = vmatprep.mubr.msk.f32.mxu1 %vm3311_vm0, %v3312_v4 }
0x16e5   :  { %v1176_v27 = vpop.f32.mrb[10].mxu1  ;;  %v1257_v19 = vpop.f32.mrb[16].mxu0 }
0x16e6   :  { %v1177_v28 = vadd.f32 %v2557_v25, %v1176_v27  ;;  %v1258_v63 = vadd.f32 %v2559_v14, %v1257_v19  ;;  %v2866_v20 = vpop.f32.mrb[11].mxu1  ;;  %v2877_v1 = vpop.f32.mrb[17].mxu0 }
0x16e8   :  { %1262 = vst.msk [vmem:[%s3963_s20] sm:$0xff] %vm1261_vm2, %v1177_v28  ;;  %1263 = vst.msk [vmem:[%s3964_s21] sm:$0xff] %vm1261_vm2, %v1258_v63  ;;  %v1265_v24 = vmul.f32 0.5, %v1258_v63 }
0x16ea   :  { %v1266_v2 = vmul.f32 1.442695, %v1265_v24 }
0x16ec   :  { %3244 = vpow2.f32 %v1266_v2 }
0x16ee   :  { %v1342_v6 = vpop.f32.mrb[12].mxu1 }
0x16ef   :  { %v2888_v7 = vpop.f32.mrb[13].mxu1 }
0x16f6   :  { %v3245_v40 = vpop.eup %3244  ;;  %v2906_v11 = vpop.f32.mrb[14].mxu1 }
0x16f7   :  { %v1268_v46 = vmul.f32 %v3245_v40, %v1264_v3  ;;  %v1504_v12 = vpop.f32.mrb[15].mxu1  ;;  %v1510_v50 = vadd.f32 %v2906_v11, %v3791_v29 }
0x16f8   :  { %v1505_v30 = vadd.f32 %v3791_v29, %v1504_v12 }
0x16f9   :  { %v1269_v5 = vadd.f32 %v1268_v46, %v1177_v28 }
0x16fa   :  { %v2909_v61 = vpop.f32.mrb[16].mxu1 }
0x16fb   :  { %2894 = vmatmul.mubr.msk.f32.vlgmr.msra.gmra.mrb[18].mxu0 %vm1261_vm2, %v1269_v5  ;;  %v1514_v25 = vpop.f32.mrb[17].mxu1 }
0x16fc   :  { %3117 = vmatpush3.bf16.msra.mxu0 %v3724_v62  ;;  %2924 = vmatprep.mubr.msk.f32.mxu0 %vm3311_vm0, %v3312_v4  ;;  %v1515_v24 = vadd.f32 %v3791_v29, %v1514_v25 }
0x16fd   :  { %3118 = vmatprep.subr.bf16.mxu0 %v3310_v0 }
0x16fe   :  { %v3810_v14 = vpop.f32.mrb[18].mxu1 }
0x16ff   :  { %v3812_v27 = vpop.f32.mrb[19].mxu1 }
0x1700   :  { %3120 = vmatpush3.bf16.msra.mxu0 %v3772_v10 }
0x1701   :  { %3121 = vmatprep.subr.bf16.mxu0 %v3310_v0 }
0x1702   :  { %v3814_v19 = vpop.f32.mrb[20].mxu1 }
0x1703   :  { %v3816_v28 = vpop.f32.mrb[21].mxu1 }
0x17ce   :  { %v1415_v13 = vpop.f32.mrb[18].mxu0 }
0x17cf   :  { %v1416_v18 = vadd.f32 %v1415_v13, %v1342_v6  ;;  %v2895_v22 = vpop.f32.mrb[19].mxu0 }
0x17d1   :  { %v1426_v23 = vadd.f32 %v2563_v17, %v1416_v18 }
0x17d3   :  { %2925 = vmatmul.mubr.msk.f32.vlgmr.msra.gmra.mrb[20].mxu0 %vm85_vm1, %v1426_v23 }
0x17d4   :  { %3123 = vmatpush3.bf16.msra.mxu0 %v3724_v62  ;;  %2935 = vmatprep.mubr.msk.f32.mxu0 %vm3311_vm0, %v3312_v4 }
0x17d5   :  { %3124 = vmatprep.subr.bf16.mxu0 %v3310_v0 }
0x17d8   :  { %3126 = vmatpush3.bf16.msra.mxu0 %v3772_v10 }
0x17d9   :  { %3133 = vmatprep.subr.bf16.mxu0 %v3310_v0 }
0x18a6   :  { %v1616_v38 = vpop.f32.mrb[20].mxu0 }
0x18a7   :  { %v1620_v31 = vadd.f32 %v1616_v38, %v1505_v30  ;;  %v2926_v36 = vpop.f32.mrb[21].mxu0  ;;  %v1520_v38 = vadd.f32 %v2909_v61, %v3791_v29 }
0x18a9   :  { %3246 = vtanh.f32 %v1620_v31  ;;  %v2574_v33 = vmul.f32 -1.442695, %v1620_v31 }
0x18ab   :  { %3248 = vpow2.f32 %v2574_v33 }
0x18b3   :  { %v3247_v32 = vpop.eup %3246 }
0x18b4   :  { %1630 = vrot.lane.b32.xlu0 %v3247_v32, %s3313_s26 }
0x18b5   :  { %v3249_v35 = vpop.eup %3248 }
0x18b6   :  { %v1624_v37 = vadd.f32 1.0, %v3249_v35 }
0x18b8   :  { %3250 = vrcp.f32 %v1624_v37 }
0x18c2   :  { %v3251_v39 = vpop.eup %3250 }
0x18c3   :  { %v1628_v43 = vmul.f32 0.0, %v3251_v39 }
0x1926   :  { %v1631_v41 = vpop.permute.xlu0 %1630 }
0x1927   :  { %v1633_v42 = vmul.f32 %v3251_v39, %v1631_v41 }
0x1929   :  { %1635 = vrot.lane.b32.xlu1 %v1633_v42, %s3314_s4 }
0x199b   :  { %v1636_v21 = vpop.permute.xlu1 %1635 }
0x199c   :  { %v1638_v44 = vadd.f32 %v1636_v21, %v1628_v43 }
0x199e   :  { %3252 = vtanh.f32 %v1638_v44 }
0x19a8   :  { %v3253_v45 = vpop.eup %3252 }
0x19a9   :  { %1641 = vrot.lane.b32.xlu0 %v3253_v45, %s3313_s26 }
0x1a1b   :  { %v1642_v47 = vpop.permute.xlu0 %1641 }
0x1a1c   :  { %v1644_v49 = vmul.f32 %v3251_v39, %v1642_v47 }
0x1a1e   :  { %1646 = vrot.lane.b32.xlu1 %v1644_v49, %s3314_s4 }
0x1a90   :  { %v1647_v26 = vpop.permute.xlu1 %1646 }
0x1a91   :  { %1649 = vst.msk [vmem:[#allocation2] sm:$0xff] %vm85_vm1, %v1647_v26  ;;  %2936 = vmatmul.mubr.msk.f32.vlgmr.msra.gmra.mrb[22].mxu0 %vm85_vm1, %v1647_v26 }
0x1a92   :  { %3135 = vmatpush3.bf16.msra.mxu0 %v3724_v62  ;;  %2957 = vmatprep.mubr.msk.f32.mxu0 %vm3311_vm0, %v3312_v4 }
0x1a93   :  { %3136 = vmatprep.subr.bf16.mxu0 %v3310_v0 }
0x1a96   :  { %3138 = vmatpush3.bf16.msra.mxu0 %v3772_v10 }
0x1a97   :  { %3145 = vmatprep.subr.bf16.mxu0 %v3310_v0 }
0x1b64   :  { %v1718_v48 = vpop.f32.mrb[22].mxu0 }
0x1b65   :  { %v1722_v34 = vadd.f32 %v1718_v48, %v1510_v50  ;;  %v2937_v51 = vpop.f32.mrb[23].mxu0  ;;  %v1525_v48 = vadd.f32 %v3791_v29, %v3812_v27 }
0x1b67   :  { %3254 = vtanh.f32 %v1722_v34  ;;  %v2576_v53 = vmul.f32 -1.442695, %v1722_v34 }
0x1b69   :  { %3256 = vpow2.f32 %v2576_v53 }
0x1b71   :  { %v3255_v52 = vpop.eup %3254 }
0x1b72   :  { %1732 = vrot.lane.b32.xlu0 %v3255_v52, %s3313_s26 }
0x1b73   :  { %v3257_v54 = vpop.eup %3256 }
0x1b74   :  { %v1726_v55 = vadd.f32 1.0, %v3257_v54 }
0x1b76   :  { %3258 = vrcp.f32 %v1726_v55 }
0x1b80   :  { %v3259_v56 = vpop.eup %3258 }
0x1b81   :  { %v1730_v59 = vmul.f32 %v3259_v56, %v1638_v44 }
0x1be4   :  { %v1733_v57 = vpop.permute.xlu0 %1732 }
0x1be5   :  { %v1735_v58 = vmul.f32 %v3259_v56, %v1733_v57 }
0x1be7   :  { %1737 = vrot.lane.b32.xlu1 %v1735_v58, %s3314_s4 }
0x1c59   :  { %v1738_v15 = vpop.permute.xlu1 %1737 }
0x1c5a   :  { %v1740_v60 = vadd.f32 %v1738_v15, %v1730_v59 }
0x1c5c   :  { %3260 = vtanh.f32 %v1740_v60 }
0x1c66   :  { %v3261_v16 = vpop.eup %3260 }
0x1c67   :  { %1743 = vrot.lane.b32.xlu0 %v3261_v16, %s3313_s26 }
0x1cd9   :  { %v1744_v63 = vpop.permute.xlu0 %1743 }
0x1cda   :  { %v1746_v20 = vmul.f32 %v3259_v56, %v1744_v63 }
0x1cdc   :  { %1748 = vrot.lane.b32.xlu1 %v1746_v20, %s3314_s4  ;;  %v1530_v20 = vadd.f32 %v3810_v14, %v3791_v29 }
0x1d4e   :  { %v1749_v1 = vpop.permute.xlu1 %1748 }
0x1d4f   :  { %1751 = vst.msk [vmem:[#allocation2 + $0x8] sm:$0xff] %vm85_vm1, %v1749_v1  ;;  %2947 = vmatmul.mubr.msk.f32.vlgmr.msra.gmra.mrb[22].mxu1 %vm85_vm1, %v1749_v1 }
0x1d50   :  { %3141 = vmatpush3.bf16.msra.mxu1 %v3724_v62  ;;  %2968 = vmatprep.mubr.msk.f32.mxu1 %vm3311_vm0, %v3312_v4 }
0x1d51   :  { %3142 = vmatprep.subr.bf16.mxu1 %v3310_v0 }
0x1d54   :  { %3144 = vmatpush3.bf16.msra.mxu1 %v3772_v10 }
0x1d55   :  { %3151 = vmatprep.subr.bf16.mxu1 %v3310_v0 }
0x1e22   :  { %v1820_v2 = vpop.f32.mrb[22].mxu1 }
0x1e23   :  { %v1824_v3 = vadd.f32 %v1820_v2, %v1515_v24  ;;  %v2948_v40 = vpop.f32.mrb[23].mxu1 }
0x1e25   :  { %3262 = vtanh.f32 %v1824_v3  ;;  %v2578_v5 = vmul.f32 -1.442695, %v1824_v3 }
0x1e27   :  { %3264 = vpow2.f32 %v2578_v5 }
0x1e2f   :  { %v3263_v46 = vpop.eup %3262 }
0x1e30   :  { %1834 = vrot.lane.b32.xlu0 %v3263_v46, %s3313_s26 }
0x1e31   :  { %v3265_v6 = vpop.eup %3264 }
0x1e32   :  { %v1828_v7 = vadd.f32 1.0, %v3265_v6 }
0x1e34   :  { %3266 = vrcp.f32 %v1828_v7  ;;  %v2372_v7 = vld [vmem:[%s3968_s17] sm:$0xff] }
0x1e3e   :  { %v3267_v8 = vpop.eup %3266 }
0x1e3f   :  { %v1832_v12 = vmul.f32 %v3267_v8, %v1740_v60 }
0x1ea2   :  { %v1835_v9 = vpop.permute.xlu0 %1834 }
0x1ea3   :  { %v1837_v11 = vmul.f32 %v3267_v8, %v1835_v9 }
0x1ea5   :  { %1839 = vrot.lane.b32.xlu1 %v1837_v11, %s3314_s4 }
0x1f17   :  { %v1840_v13 = vpop.permute.xlu1 %1839 }
0x1f18   :  { %v1842_v17 = vadd.f32 %v1840_v13, %v1832_v12 }
0x1f1a   :  { %3268 = vtanh.f32 %v1842_v17 }
0x1f24   :  { %v3269_v18 = vpop.eup %3268 }
0x1f25   :  { %1845 = vrot.lane.b32.xlu0 %v3269_v18, %s3313_s26  ;;  %v2375_v18 = vld [vmem:[%s3968_s17 + $0x18] sm:$0xff] }
0x1f97   :  { %v1846_v22 = vpop.permute.xlu0 %1845 }
0x1f98   :  { %v1848_v23 = vmul.f32 %v3267_v8, %v1846_v22  ;;  %v2373_v8 = vld [vmem:[%s3968_s17 + $0x8] sm:$0xff] }
0x1f99   :  { %v3163_v9 = vpack.c.bf16 %v2373_v8, %v2372_v7 }
0x1f9a   :  { %1850 = vrot.lane.b32.xlu1 %v1848_v23, %s3314_s4 }
0x200c   :  { %v1851_v30 = vpop.permute.xlu1 %1850 }
0x200d   :  { %1853 = vst.msk [vmem:[#allocation2 + $0x10] sm:$0xff] %vm85_vm1, %v1851_v30  ;;  %2958 = vmatmul.mubr.msk.f32.vlgmr.msra.gmra.mrb[24].mxu0 %vm85_vm1, %v1851_v30  ;;  %v2364_v30 = vld [vmem:[#allocation2] sm:$0xff] }
0x200e   :  { %3147 = vmatpush3.bf16.msra.mxu0 %v3724_v62  ;;  %2979 = vmatprep.mubr.msk.f32.mxu0 %vm3311_vm0, %v3312_v4 }
0x200f   :  { %3148 = vmatprep.subr.bf16.mxu0 %v3310_v0 }
0x2012   :  { %3150 = vmatpush3.bf16.msra.mxu0 %v3772_v10 }
0x2013   :  { %3157 = vmatprep.subr.bf16.mxu0 %v3310_v0 }
0x20e0   :  { %v1922_v31 = vpop.f32.mrb[24].mxu0 }
0x20e1   :  { %v1926_v36 = vadd.f32 %v1922_v31, %v1520_v38  ;;  %v2959_v32 = vpop.f32.mrb[25].mxu0  ;;  %v2365_v38 = vld [vmem:[#allocation2 + $0x8] sm:$0xff]  ;;  %v2366_v31 = vld [vmem:[#allocation2 + $0x10] sm:$0xff] }
0x20e3   :  { %3270 = vtanh.f32 %v1926_v36  ;;  %v2580_v35 = vmul.f32 -1.442695, %v1926_v36 }
0x20e5   :  { %3272 = vpow2.f32 %v2580_v35  ;;  %v1535_v35 = vadd.f32 %v3791_v29, %v3816_v28 }
0x20ed   :  { %v3271_v33 = vpop.eup %3270 }
0x20ee   :  { %1936 = vrot.lane.b32.xlu0 %v3271_v33, %s3313_s26 }
0x20ef   :  { %v3273_v37 = vpop.eup %3272 }
0x20f0   :  { %v1930_v39 = vadd.f32 1.0, %v3273_v37 }
0x20f2   :  { %3274 = vrcp.f32 %v1930_v39 }
0x20fc   :  { %v3275_v41 = vpop.eup %3274 }
0x20fd   :  { %v1934_v21 = vmul.f32 %v3275_v41, %v1842_v17  ;;  %v2374_v17 = vld [vmem:[%s3968_s17 + $0x10] sm:$0xff] }
0x20fe   :  { %v3167_v22 = vpack.c.bf16 %v2375_v18, %v2374_v17 }
0x2160   :  { %v1937_v42 = vpop.permute.xlu0 %1936 }
0x2161   :  { %v1939_v43 = vmul.f32 %v3275_v41, %v1937_v42  ;;  %v3899_v42 = vld [vmem:[%s3969_s18] ss:$0 sm:$0xff] }
0x2163   :  { %1941 = vrot.lane.b32.xlu1 %v1939_v43, %s3314_s4 }
0x21d5   :  { %v1942_v44 = vpop.permute.xlu1 %1941 }
0x21d6   :  { %v1944_v45 = vadd.f32 %v1942_v44, %v1934_v21 }
0x21d8   :  { %3276 = vtanh.f32 %v1944_v45 }
0x21e2   :  { %v3277_v47 = vpop.eup %3276 }
0x21e3   :  { %1947 = vrot.lane.b32.xlu0 %v3277_v47, %s3313_s26 }
0x2255   :  { %v1948_v49 = vpop.permute.xlu0 %1947 }
0x2256   :  { %v1950_v26 = vmul.f32 %v3275_v41, %v1948_v49 }
0x2258   :  { %1952 = vrot.lane.b32.xlu1 %v1950_v26, %s3314_s4 }
0x22ca   :  { %v1953_v50 = vpop.permute.xlu1 %1952 }
0x22cb   :  { %1955 = vst.msk [vmem:[#allocation2 + $0x18] sm:$0xff] %vm85_vm1, %v1953_v50  ;;  %2969 = vmatmul.mubr.msk.f32.vlgmr.msra.gmra.mrb[24].mxu1 %vm85_vm1, %v1953_v50 }
0x22cc   :  { %3153 = vmatpush3.bf16.msra.mxu1 %v3724_v62  ;;  %2990 = vmatprep.mubr.msk.f32.mxu1 %vm3311_vm0, %v3312_v4 }
0x22cd   :  { %3154 = vmatprep.subr.bf16.mxu1 %v3310_v0 }
0x22d0   :  { %3156 = vmatpush3.bf16.msra.mxu1 %v3772_v10 }
0x22d1   :  { %3164 = vmatprep.subr.bf16.mxu1 %v3163_v9 }
0x22d2   :  { %v2367_v36 = vld [vmem:[#allocation2 + $0x18] sm:$0xff] }
0x239e   :  { %v2024_v34 = vpop.f32.mrb[24].mxu1 }
0x239f   :  { %v2028_v51 = vadd.f32 %v2024_v34, %v1525_v48  ;;  %v2970_v52 = vpop.f32.mrb[25].mxu1 }
0x23a1   :  { %3278 = vtanh.f32 %v2028_v51  ;;  %v2582_v54 = vmul.f32 -1.442695, %v2028_v51 }
0x23a3   :  { %3280 = vpow2.f32 %v2582_v54 }
0x23ab   :  { %v3279_v53 = vpop.eup %3278 }
0x23ac   :  { %2038 = vrot.lane.b32.xlu0 %v3279_v53, %s3313_s26 }
0x23ad   :  { %v3281_v55 = vpop.eup %3280 }
0x23ae   :  { %v2032_v56 = vadd.f32 1.0, %v3281_v55 }
0x23b0   :  { %3282 = vrcp.f32 %v2032_v56 }
0x23ba   :  { %v3283_v57 = vpop.eup %3282 }
0x23bb   :  { %v2036_v15 = vmul.f32 %v3283_v57, %v1944_v45 }
0x241e   :  { %v2039_v58 = vpop.permute.xlu0 %2038 }
0x241f   :  { %v2041_v59 = vmul.f32 %v3283_v57, %v2039_v58 }
0x2421   :  { %2043 = vrot.lane.b32.xlu1 %v2041_v59, %s3314_s4 }
0x2493   :  { %v2044_v60 = vpop.permute.xlu1 %2043 }
0x2494   :  { %v2046_v16 = vadd.f32 %v2044_v60, %v2036_v15 }
0x2496   :  { %3284 = vtanh.f32 %v2046_v16 }
0x24a0   :  { %v3285_v61 = vpop.eup %3284 }
0x24a1   :  { %2049 = vrot.lane.b32.xlu0 %v3285_v61, %s3313_s26 }
0x2513   :  { %v2050_v25 = vpop.permute.xlu0 %2049 }
0x2514   :  { %v2052_v27 = vmul.f32 %v3283_v57, %v2050_v25 }
0x2516   :  { %2054 = vrot.lane.b32.xlu1 %v2052_v27, %s3314_s4 }
0x2588   :  { %v2055_v63 = vpop.permute.xlu1 %2054 }
0x2589   :  { %2057 = vst.msk [vmem:[#allocation2 + $0x20] sm:$0xff] %vm85_vm1, %v2055_v63  ;;  %2980 = vmatmul.mubr.msk.f32.vlgmr.msra.gmra.mrb[26].mxu0 %vm85_vm1, %v2055_v63 }
0x258a   :  { %3159 = vmatpush3.bf16.msra.mxu0 %v3724_v62  ;;  %3001 = vmatprep.mubr.msk.f32.mxu0 %vm3311_vm0, %v3312_v4 }
0x258b   :  { %3160 = vmatprep.subr.bf16.mxu0 %v3310_v0 }
0x258e   :  { %3162 = vmatpush3.bf16.msra.mxu0 %v3772_v10 }
0x2590   :  { %v2368_v32 = vld [vmem:[#allocation2 + $0x20] sm:$0xff] }
0x265c   :  { %v2126_v1 = vpop.f32.mrb[26].mxu0 }
0x265d   :  { %v2130_v24 = vadd.f32 %v2126_v1, %v1530_v20  ;;  %v2981_v2 = vpop.f32.mrb[27].mxu0  ;;  %v1540_v20 = vadd.f32 %v3814_v19, %v3791_v29 }
0x265f   :  { %3286 = vtanh.f32 %v2130_v24  ;;  %v2584_v40 = vmul.f32 -1.442695, %v2130_v24 }
0x2661   :  { %3288 = vpow2.f32 %v2584_v40 }
0x2669   :  { %v3287_v3 = vpop.eup %3286 }
0x266a   :  { %2140 = vrot.lane.b32.xlu0 %v3287_v3, %s3313_s26 }
0x266b   :  { %v3289_v62 = vpop.eup %3288 }
0x266c   :  { %v2134_v46 = vadd.f32 1.0, %v3289_v62 }
0x266e   :  { %3290 = vrcp.f32 %v2134_v46 }
0x2678   :  { %v3291_v4 = vpop.eup %3290 }
0x2679   :  { %v2138_v10 = vmul.f32 %v3291_v4, %v2046_v16 }
0x26dc   :  { %v2141_v5 = vpop.permute.xlu0 %2140 }
0x26dd   :  { %v2143_v0 = vmul.f32 %v3291_v4, %v2141_v5 }
0x26df   :  { %2145 = vrot.lane.b32.xlu1 %v2143_v0, %s3314_s4 }
0x2751   :  { %v2146_v6 = vpop.permute.xlu1 %2145 }
0x2752   :  { %v3869_v14 = vadd.f32 %v2146_v6, %v2138_v10 }
0x2754   :  { %3292 = vtanh.f32 %v3869_v14 }
0x275e   :  { %v3293_v11 = vpop.eup %3292 }
0x275f   :  { %2151 = vrot.lane.b32.xlu0 %v3293_v11, %s3313_s26 }
0x27d1   :  { %v2152_v12 = vpop.permute.xlu0 %2151 }
0x27d2   :  { %v2154_v13 = vmul.f32 %v3291_v4, %v2152_v12 }
0x27d4   :  { %2156 = vrot.lane.b32.xlu1 %v2154_v13, %s3314_s4 }
0x2846   :  { %v2157_v23 = vpop.permute.xlu1 %2156 }
0x2847   :  { %2159 = vst.msk [vmem:[#allocation2 + $0x28] sm:$0xff] %vm85_vm1, %v2157_v23  ;;  %2991 = vmatmul.mubr.msk.f32.vlgmr.msra.gmra.mrb[26].mxu1 %vm85_vm1, %v2157_v23 }
0x2848   :  { %3166 = vmatpush3.bf16.msra.mxu1 %v3163_v9  ;;  %3012 = vmatprep.mubr.msk.f32.mxu1 %vm85_vm1, %v2364_v30 }
0x2849   :  { %3168 = vmatprep.subr.bf16.mxu1 %v3167_v22 }
0x284c   :  { %3170 = vmatpush3.bf16.msra.mxu1 %v3167_v22 }
0x284e   :  { %v2369_v33 = vld [vmem:[#allocation2 + $0x28] sm:$0xff] }
0x284f   :  { %3013 = vmatmul.mubr.msk.f32.vlgmr.msra.gmra.mrb[28].mxu1 %vm85_vm1, %v2365_v38 }
0x2850   :  { %3015 = vmatprep.mubr.msk.f32.mxu1 %vm85_vm1, %v2366_v31 }
0x2853   :  { %3016 = vmatmul.mubr.msk.f32.gmra.mrb[30].mxu1 %vm85_vm1, %v2367_v36 }
0x2854   :  { %3018 = vmatprep.mubr.msk.f32.mxu1 %vm85_vm1, %v2368_v32 }
0x2857   :  { %3019 = vmatmul.mubr.msk.f32.gmra.mrb[32].mxu1 %vm85_vm1, %v2369_v33 }
0x291a   :  { %v2228_v37 = vpop.f32.mrb[26].mxu1 }
0x291b   :  { %v2232_v39 = vadd.f32 %v2228_v37, %v1535_v35  ;;  %v2992_v41 = vpop.f32.mrb[27].mxu1 }
0x291d   :  { %3294 = vtanh.f32 %v2232_v39  ;;  %v2586_v53 = vmul.f32 -1.442695, %v2232_v39 }
0x291f   :  { %3296 = vpow2.f32 %v2586_v53 }
0x2922   :  { %v3014_v43 = vpop.f32.mrb[28].mxu1 }
0x2923   :  { %v2479_v21 = vadd.f32 %v3014_v43, %v3899_v42  ;;  %v2473_v44 = vpop.f32.mrb[29].mxu1 }
0x2924   :  { %v2474_v45 = vadd.f32 %v3899_v42, %v2473_v44 }
0x2925   :  { %2513 = vst [vmem:[%s3970_s19 + $0x8] sm:$0xff] %v2479_v21 }
0x2926   :  { %2512 = vst [vmem:[%s3970_s19] sm:$0xff] %v2474_v45  ;;  %v3017_v28 = vpop.f32.mrb[30].mxu1 }
0x2927   :  { %v3295_v47 = vpop.eup %3294  ;;  %v2489_v49 = vadd.f32 %v3017_v28, %v3899_v42  ;;  %v2483_v26 = vpop.f32.mrb[31].mxu1 }
0x2928   :  { %v2484_v50 = vadd.f32 %v3899_v42, %v2483_v26  ;;  %2242 = vrot.lane.b32.xlu0 %v3295_v47, %s3313_s26 }
0x2929   :  { %2515 = vst [vmem:[%s3970_s19 + $0x18] sm:$0xff] %v2489_v49  ;;  %v3297_v54 = vpop.eup %3296 }
0x292a   :  { %2514 = vst [vmem:[%s3970_s19 + $0x10] sm:$0xff] %v2484_v50  ;;  %v3020_v48 = vpop.f32.mrb[32].mxu1  ;;  %v2236_v55 = vadd.f32 1.0, %v3297_v54 }
0x292b   :  { %v2499_v34 = vadd.f32 %v3020_v48, %v3899_v42  ;;  %v2493_v51 = vpop.f32.mrb[33].mxu1 }
0x292c   :  { %v2494_v52 = vadd.f32 %v3899_v42, %v2493_v51  ;;  %3298 = vrcp.f32 %v2236_v55 }
0x292d   :  { %2517 = vst [vmem:[%s3970_s19 + $0x28] sm:$0xff] %v2499_v34 }
0x292e   :  { %2516 = vst [vmem:[%s3970_s19 + $0x20] sm:$0xff] %v2494_v52 }
0x2936   :  { %v3299_v56 = vpop.eup %3298 }
0x2937   :  { %v2240_v59 = vmul.f32 %v3299_v56, %v3869_v14 }
0x299a   :  { %v2243_v57 = vpop.permute.xlu0 %2242 }
0x299b   :  { %v2245_v58 = vmul.f32 %v3299_v56, %v2243_v57 }
0x299d   :  { %2247 = vrot.lane.b32.xlu1 %v2245_v58, %s3314_s4 }
0x2a0f   :  { %v2248_v15 = vpop.permute.xlu1 %2247 }
0x2a10   :  { %v2250_v60 = vadd.f32 %v2248_v15, %v2240_v59 }
0x2a12   :  { %3300 = vtanh.f32 %v2250_v60 }
0x2a1c   :  { %v3301_v16 = vpop.eup %3300 }
0x2a1d   :  { %2253 = vrot.lane.b32.xlu0 %v3301_v16, %s3313_s26 }
0x2a8f   :  { %v2254_v61 = vpop.permute.xlu0 %2253 }
0x2a90   :  { %v2256_v25 = vmul.f32 %v3299_v56, %v2254_v61 }
0x2a92   :  { %2258 = vrot.lane.b32.xlu1 %v2256_v25, %s3314_s4 }
0x2b04   :  { %v2259_v27 = vpop.permute.xlu1 %2258 }
0x2b05   :  { %2261 = vst.msk [vmem:[#allocation2 + $0x30] sm:$0xff] %vm85_vm1, %v2259_v27  ;;  %3002 = vmatmul.mubr.msk.f32.vlgmr.msra.gmra.mrb[28].mxu0 %vm85_vm1, %v2259_v27 }
0x2b0c   :  { %v2370_v63 = vld [vmem:[#allocation2 + $0x30] sm:$0xff] }
0x2b0d   :  { %3021 = vmatprep.mubr.msk.f32.mxu1 %vm85_vm1, %v2370_v63 }
0x2bd8   :  { %v2330_v1 = vpop.f32.mrb[28].mxu0 }
0x2bd9   :  { %v2334_v24 = vadd.f32 %v2330_v1, %v1540_v20  ;;  %v3003_v2 = vpop.f32.mrb[29].mxu0 }
0x2bdb   :  { %3302 = vtanh.f32 %v2334_v24  ;;  %v2588_v40 = vmul.f32 -1.442695, %v2334_v24 }
0x2bdd   :  { %3304 = vpow2.f32 %v2588_v40 }
0x2be5   :  { %v3303_v3 = vpop.eup %3302 }
0x2be6   :  { %2344 = vrot.lane.b32.xlu0 %v3303_v3, %s3313_s26 }
0x2be7   :  { %v3305_v62 = vpop.eup %3304 }
0x2be8   :  { %v2338_v46 = vadd.f32 1.0, %v3305_v62 }
0x2bea   :  { %3306 = vrcp.f32 %v2338_v46 }
0x2bf4   :  { %v3307_v4 = vpop.eup %3306 }
0x2bf5   :  { %v2342_v10 = vmul.f32 %v3307_v4, %v2250_v60 }
0x2c58   :  { %v2345_v5 = vpop.permute.xlu0 %2344 }
0x2c59   :  { %v2347_v0 = vmul.f32 %v3307_v4, %v2345_v5 }
0x2c5b   :  { %2349 = vrot.lane.b32.xlu1 %v2347_v0, %s3314_s4 }
0x2ccd   :  { %v2350_v6 = vpop.permute.xlu1 %2349 }
0x2cce   :  { %v2352_v29 = vadd.f32 %v2350_v6, %v2342_v10 }
0x2cd0   :  { %3308 = vtanh.f32 %v2352_v29 }
0x2cda   :  { %v3309_v19 = vpop.eup %3308 }
0x2cdb   :  { %2355 = vrot.lane.b32.xlu0 %v3309_v19, %s3313_s26 }
0x2d4d   :  { %v2356_v14 = vpop.permute.xlu0 %2355 }
0x2d4e   :  { %v2358_v7 = vmul.f32 %v3307_v4, %v2356_v14 }
0x2d50   :  { %2360 = vrot.lane.b32.xlu1 %v2358_v7, %s3314_s4 }
0x2dc2   :  { %v2361_v8 = vpop.permute.xlu1 %2360 }
0x2dc3   :  { %2363 = vst.msk [vmem:[#allocation2 + $0x38] sm:$0xff] %vm85_vm1, %v2361_v8 }
0x2dca   :  { %v2371_v9 = vld [vmem:[#allocation2 + $0x38] sm:$0xff] }
0x2dcb   :  { %3022 = vmatmul.mubr.msk.f32.gmra.mrb[34].mxu1 %vm85_vm1, %v2371_v9 }
0x2e9e   :  { %v3023_v11 = vpop.f32.mrb[34].mxu1 }
0x2e9f   :  { %v2509_v12 = vadd.f32 %v3023_v11, %v3899_v42  ;;  %v2503_v13 = vpop.f32.mrb[35].mxu1 }
0x2ea0   :  { %v2504_v17 = vadd.f32 %v3899_v42, %v2503_v13 }
0x2ea1   :  { %2519 = vst [vmem:[%s3970_s19 + $0x38] sm:$0xff] %v2509_v12 }
0x2ea2   :  { %2518 = vst [vmem:[%s3970_s19 + $0x30] sm:$0xff] %v2504_v17 }

</bundles_post_ra>
